<compile_context>
chip_gen: v7x
topology: tpu7x:2x2x1
jax: 0.10.0
libtpu: 0.0.40
codegen_flags: <defaults>
</compile_context>

<pallas_src>
import functools

import jax
import jax.numpy as jnp
from jax import lax
from jax.experimental import pallas as pl
from jax.experimental.pallas import tpu as pltpu


def _gelu_tanh(x):
    # PyTorch nn.GELU(approximate='tanh')
    c = 0.7978845608028654  # sqrt(2 / pi)
    return 0.5 * x * (1.0 + jnp.tanh(c * (x + 0.044715 * x * x * x)))


def _layernorm(x, eps=1e-6):
    # nn.LayerNorm(hidden, elementwise_affine=False, eps=1e-6), stable two-pass.
    mean = jnp.mean(x, axis=-1, keepdims=True)
    xc = x - mean
    var = jnp.mean(xc * xc, axis=-1, keepdims=True)
    return xc * lax.rsqrt(var + eps)


# ---------------------------------------------------------------------------
# Kernel 1: LayerNorm1 + modulate(msa) + QKV projection, head-major outputs.
# ---------------------------------------------------------------------------
def qkv_proj_kernel(x_ref, mod_ref, w_qkv_ref, b_qkv_ref,
                    q_ref, k_ref, v_ref, *, num_heads, head_dim):
    nh, hd = num_heads, head_dim
    H = x_ref.shape[-1]

    x = x_ref[...]                                   # (T, H) f32
    shift_msa = mod_ref[0:1, :]
    scale1p_msa = mod_ref[1:2, :]                    # 1 + scale_msa (pre-added)

    xm = _layernorm(x) * scale1p_msa + shift_msa
    qkv = jnp.dot(xm.astype(jnp.bfloat16), w_qkv_ref[...],
                  preferred_element_type=jnp.float32) + b_qkv_ref[...]  # (T, 3H)
    qkv = qkv.astype(jnp.bfloat16)                   # single hoisted bf16 cast

    # Head split / relayout is done ONCE per token here, so the attention
    # kernel streams already-head-major tiles.
    for idx, out in enumerate((q_ref, k_ref, v_ref)):
        base = idx * H                               # lane-aligned when H % 128 == 0
        for h in range(nh):
            out[h] = qkv[:, base + h * hd: base + (h + 1) * hd]


# ---------------------------------------------------------------------------
# Kernel 2: flash attention (online softmax over KV tiles) + out-proj + MLP.
# ---------------------------------------------------------------------------
def flash_attn_mlp_kernel(x_ref, mod_ref, q_ref, k_ref, v_ref,
                          w_proj_ref, b_proj_ref,
                          w_fc1_ref, b_fc1_ref, w_fc2_ref, b_fc2_ref,
                          o_ref, m_scr, l_scr, acc_scr,
                          *, num_heads, head_dim):
    nh, hd = num_heads, head_dim
    ki = pl.program_id(2)
    nk = pl.num_programs(2)

    @pl.when(ki == 0)
    def _():
        m_scr[...] = jnp.full(m_scr.shape, -jnp.inf, m_scr.dtype)
        l_scr[...] = jnp.zeros(l_scr.shape, l_scr.dtype)
        acc_scr[...] = jnp.zeros(acc_scr.shape, acc_scr.dtype)

    # ---- one (TQ, TK) score tile per head, online-softmax update ----
    s = jnp.einsum("hqd,hkd->hqk", q_ref[...], k_ref[...],
                   preferred_element_type=jnp.float32) * (float(hd) ** -0.5)
    m_prev = m_scr[...]
    m_new = jnp.maximum(m_prev, jnp.max(s, axis=-1, keepdims=True))
    alpha = jnp.exp(m_prev - m_new)
    p = jnp.exp(s - m_new)
    l_scr[...] = alpha * l_scr[...] + jnp.sum(p, axis=-1, keepdims=True)
    acc_scr[...] = alpha * acc_scr[...] + jnp.einsum(
        "hqk,hkd->hqd", p.astype(jnp.bfloat16), v_ref[...],
        preferred_element_type=jnp.float32)
    m_scr[...] = m_new

    # ---- last KV step: projection + residual + MLP fused into the store ----
    @pl.when(ki == nk - 1)
    def _():
        o_heads = (acc_scr[...] *
                   pl.reciprocal(l_scr[...], approx=True)).astype(jnp.bfloat16)
        # Fold heads back onto the lane axis, then ONE K=H projection matmul
        # instead of nh under-filled K=hd dots (MXU-utilization review item).
        o_tok = jnp.concatenate([o_heads[h] for h in range(nh)], axis=-1)
        attn = jnp.dot(o_tok, w_proj_ref[...],
                       preferred_element_type=jnp.float32) + b_proj_ref[...]

        gate_msa = mod_ref[2:3, :]
        shift_mlp = mod_ref[3:4, :]
        scale1p_mlp = mod_ref[4:5, :]                # 1 + scale_mlp (pre-added)
        gate_mlp = mod_ref[5:6, :]

        xres = x_ref[...] + gate_msa * attn          # (TQ, H) f32

        xm2 = _layernorm(xres) * scale1p_mlp + shift_mlp
        h1 = jnp.dot(xm2.astype(jnp.bfloat16), w_fc1_ref[...],
                     preferred_element_type=jnp.float32) + b_fc1_ref[...]
        h1 = _gelu_tanh(h1)
        h2 = jnp.dot(h1.astype(jnp.bfloat16), w_fc2_ref[...],
                     preferred_element_type=jnp.float32) + b_fc2_ref[...]
        o_ref[...] = (xres + gate_mlp * h2).astype(o_ref.dtype)


# ---------------------------------------------------------------------------
# Wrapper
# ---------------------------------------------------------------------------
def _vmem_limit_bytes(frac=0.85):
    # Derive the scoped VMEM limit from the hardware with ~15% headroom
    # (review item: never request the full physical VMEM).
    try:
        cap = int(pltpu.get_tpu_info().vmem_capacity_bytes)
    except Exception:
        cap = 64 * 1024 * 1024   # conservative: minimum across v5e/v6e/v7x
    return int(cap * frac)


def _const_spec(shape):
    # Weights/biases whose block index never changes: single-buffered, since
    # they are fetched once and double-buffering would only waste VMEM.
    return pl.BlockSpec(shape, lambda *_: (0,) * len(shape),
                        pipeline_mode=pl.Buffered(1))


def dit_block(x, t, params, num_heads, *, q_tile=128, kv_tile=128):
    """Fused DiTBlock forward.  x: (B, N, H) f32, t: (B, H) f32."""
    B, N, H = x.shape
    assert H % num_heads == 0
    hd = H // num_heads
    Hm = params["w_fc1"].shape[1]

    TQ = min(q_tile, N)
    TK = min(kv_tile, N)
    if N % TQ or N % TK:
        raise ValueError("N must be divisible by the token tile sizes")
    nq, nk = N // TQ, N // TK

    # adaLN-single hoisted out of the kernels (tiny (B,H)x(H,6H) matmul); rows:
    # [shift_msa, 1+scale_msa, gate_msa, shift_mlp, 1+scale_mlp, gate_mlp].
    silu_t = t * jax.nn.sigmoid(t)
    ada = silu_t @ params["w_ada"] + params["b_ada"]
    mod = ada.reshape(B, 6, H)
    mod = mod.at[:, 1, :].add(1.0)
    mod = mod.at[:, 4, :].add(1.0)
    mod = mod.astype(jnp.float32)

    w_qkv = params["w_qkv"].astype(jnp.bfloat16)
    b_qkv = params["b_qkv"].astype(jnp.float32)
    w_proj = params["w_proj"].astype(jnp.bfloat16)
    b_proj = params["b_proj"].astype(jnp.float32)
    w_fc1 = params["w_fc1"].astype(jnp.bfloat16)
    b_fc1 = params["b_fc1"].astype(jnp.float32)
    w_fc2 = params["w_fc2"].astype(jnp.bfloat16)
    b_fc2 = params["b_fc2"].astype(jnp.float32)

    vmem_limit = _vmem_limit_bytes()

    # ------------------- kernel 1: QKV projection -------------------
    qkv_flops = 2 * B * N * H * 3 * H
    qkv_bytes = (B * N * H * 4 + B * 6 * H * 4 + 2 * H * 3 * H + 4 * 3 * H
                 + 3 * B * N * H * 2)
    q, k, v = pl.pallas_call(
        functools.partial(qkv_proj_kernel, num_heads=num_heads, head_dim=hd),
        out_shape=tuple(
            jax.ShapeDtypeStruct((B, num_heads, N, hd), jnp.bfloat16)
            for _ in range(3)),
        grid=(B, nq),
        in_specs=[
            pl.BlockSpec((None, TQ, H), lambda b, i: (b, i, 0)),   # x tile
            pl.BlockSpec((None, 6, H), lambda b, i: (b, 0, 0)),    # modulation rows
            _const_spec((H, 3 * H)),
            _const_spec((1, 3 * H)),
        ],
        out_specs=tuple(
            pl.BlockSpec((None, num_heads, TQ, hd), lambda b, i: (b, 0, i, 0))
            for _ in range(3)),
        compiler_params=pltpu.CompilerParams(
            dimension_semantics=("parallel", "parallel"),
            vmem_limit_bytes=vmem_limit),
        cost_estimate=pl.CostEstimate(
            flops=qkv_flops, transcendentals=B * N, bytes_accessed=qkv_bytes),
    )(x, mod, w_qkv, b_qkv)

    # --------- kernel 2: flash attention + out-proj + residual + MLP ---------
    attn_flops = B * (4 * N * N * H + 2 * N * H * H + 4 * N * H * Hm)
    attn_trans = B * (num_heads * N * N + N * Hm + 2 * N)
    attn_bytes = (2 * B * N * H * 4 + B * 6 * H * 4
                  + B * N * H * 2 + 2 * B * N * H * 2 * nq
                  + 2 * (H * H + 2 * H * Hm) + 4 * (3 * H + Hm))
    out = pl.pallas_call(
        functools.partial(flash_attn_mlp_kernel, num_heads=num_heads, head_dim=hd),
        out_shape=jax.ShapeDtypeStruct((B, N, H), x.dtype),
        grid=(B, nq, nk),
        in_specs=[
            pl.BlockSpec((None, TQ, H), lambda b, qi, ki: (b, qi, 0)),   # x (residual)
            pl.BlockSpec((None, 6, H), lambda b, qi, ki: (b, 0, 0)),     # modulation
            pl.BlockSpec((None, num_heads, TQ, hd),
                         lambda b, qi, ki: (b, 0, qi, 0)),               # q tile
            pl.BlockSpec((None, num_heads, TK, hd),
                         lambda b, qi, ki: (b, 0, ki, 0)),               # k stream
            pl.BlockSpec((None, num_heads, TK, hd),
                         lambda b, qi, ki: (b, 0, ki, 0)),               # v stream
            _const_spec((H, H)), _const_spec((1, H)),                    # attn proj
            _const_spec((H, Hm)), _const_spec((1, Hm)),                  # mlp fc1
            _const_spec((Hm, H)), _const_spec((1, H)),                   # mlp fc2
        ],
        out_specs=pl.BlockSpec((None, TQ, H), lambda b, qi, ki: (b, qi, 0)),
        scratch_shapes=[
            pltpu.VMEM((num_heads, TQ, 1), jnp.float32),    # running max
            pltpu.VMEM((num_heads, TQ, 1), jnp.float32),    # running sum
            pltpu.VMEM((num_heads, TQ, hd), jnp.float32),   # output accumulator
        ],
        compiler_params=pltpu.CompilerParams(
            dimension_semantics=("parallel", "parallel", "arbitrary"),
            vmem_limit_bytes=vmem_limit),
        cost_estimate=pl.CostEstimate(
            flops=attn_flops, transcendentals=attn_trans,
            bytes_accessed=attn_bytes),
    )(x, mod, q, k, v, w_proj, b_proj, w_fc1, b_fc1, w_fc2, b_fc2)
    return out


# ---------------------------------------------------------------------------
# Plain-JAX (f32) reference mirroring PyTorch DiTBlock.forward semantics.
# ---------------------------------------------------------------------------
def dit_block_reference(x, t, params, num_heads):
    B, N, H = x.shape
    hd = H // num_heads

    silu_t = t * jax.nn.sigmoid(t)
    ada = silu_t @ params["w_ada"] + params["b_ada"]            # (B, 6H)
    s_msa, sc_msa, g_msa, s_mlp, sc_mlp, g_mlp = jnp.split(ada, 6, axis=1)

    def ln(z):
        mu = jnp.mean(z, axis=-1, keepdims=True)
        var = jnp.mean((z - mu) ** 2, axis=-1, keepdims=True)
        return (z - mu) * lax.rsqrt(var + 1e-6)

    xm = ln(x) * (1.0 + sc_msa[:, None, :]) + s_msa[:, None, :]
    qkv = xm @ params["w_qkv"] + params["b_qkv"]                # (B, N, 3H)
    q, k, v = jnp.split(qkv, 3, axis=-1)
    q = q.reshape(B, N, num_heads, hd).transpose(0, 2, 1, 3)
    k = k.reshape(B, N, num_heads, hd).transpose(0, 2, 1, 3)
    v = v.reshape(B, N, num_heads, hd).transpose(0, 2, 1, 3)
    s = jnp.einsum("bhqd,bhkd->bhqk", q, k) * (float(hd) ** -0.5)
    p = jax.nn.softmax(s, axis=-1)
    o = jnp.einsum("bhqk,bhkd->bhqd", p, v).transpose(0, 2, 1, 3).reshape(B, N, H)
    o = o @ params["w_proj"] + params["b_proj"]
    x = x + g_msa[:, None, :] * o

    xm2 = ln(x) * (1.0 + sc_mlp[:, None, :]) + s_mlp[:, None, :]
    h1 = _gelu_tanh(xm2 @ params["w_fc1"] + params["b_fc1"])
    h2 = h1 @ params["w_fc2"] + params["b_fc2"]
    return x + g_mlp[:, None, :] * h2


if __name__ == "__main__":
    # Small but lane-dense smoke-test shapes (H multiple of 128, N a multiple
    # of the 128-token tiles so both grid axes are exercised).  Production
    # tuning should use real DiT shapes (H=1152, N>=1024).
    B, N, H, num_heads, mlp_ratio = 2, 256, 128, 4, 4.0
    Hm = int(H * mlp_ratio)

    key = jax.random.PRNGKey(0)
    ks = jax.random.split(key, 12)
    s = 0.02

    x = jax.random.normal(ks[0], (B, N, H), jnp.float32)
    t = jax.random.normal(ks[1], (B, H), jnp.float32)

    params = {
        "w_ada": jax.random.normal(ks[2], (H, 6 * H), jnp.float32) * s,
        "b_ada": jax.random.normal(ks[3], (1, 6 * H), jnp.float32) * s,
        "w_qkv": jax.random.normal(ks[4], (H, 3 * H), jnp.float32) * s,
        "b_qkv": jax.random.normal(ks[5], (1, 3 * H), jnp.float32) * s,
        "w_proj": jax.random.normal(ks[6], (H, H), jnp.float32) * s,
        "b_proj": jax.random.normal(ks[7], (1, H), jnp.float32) * s,
        "w_fc1": jax.random.normal(ks[8], (H, Hm), jnp.float32) * s,
        "b_fc1": jax.random.normal(ks[9], (1, Hm), jnp.float32) * s,
        "w_fc2": jax.random.normal(ks[10], (Hm, H), jnp.float32) * s,
        "b_fc2": jax.random.normal(ks[11], (1, H), jnp.float32) * s,
    }

    out = dit_block(x, t, params, num_heads)
    out = jax.block_until_ready(out)

    ref = dit_block_reference(x, t, params, num_heads)
    assert out.shape == (B, N, H)
    max_err = float(jnp.max(jnp.abs(out - ref)))
    assert jnp.allclose(out, ref, atol=1e-2, rtol=1e-2), (
        f"Pallas output mismatch vs reference (max abs err {max_err})")

    print("KERNEL_OK")
</pallas_src>

<mosaic_0001>
module attributes {stable_mosaic.version = 11 : i64} {
  func.func @qkv_proj_kernel(%arg0: i32, %arg1: i32, %arg2: memref<1x128x128xf32, #tpu.memory_space<vmem>>, %arg3: memref<1x6x128xf32, #tpu.memory_space<vmem>>, %arg4: memref<128x384xbf16, #tpu.memory_space<vmem>>, %arg5: memref<1x384xf32, #tpu.memory_space<vmem>>, %arg6: memref<1x4x128x32xbf16, #tpu.memory_space<vmem>>, %arg7: memref<1x4x128x32xbf16, #tpu.memory_space<vmem>>, %arg8: memref<1x4x128x32xbf16, #tpu.memory_space<vmem>>) attributes {dimension_semantics = [#tpu.dimension_semantics<parallel>, #tpu.dimension_semantics<parallel>], iteration_bounds = array<i64: 2, 2>, scalar_prefetch = 0 : i64, scratch_operands = 0 : i64, tpu.core_type = #tpu.core_type<tc>, window_params = [{transform_indices = @transform_0, window_bounds = array<i64: 1, 128, 128>}, {transform_indices = @transform_1, window_bounds = array<i64: 1, 6, 128>}, {pipeline_mode = #tpu.pipeline_mode<synchronous>, transform_indices = @transform_2, window_bounds = array<i64: 128, 384>}, {pipeline_mode = #tpu.pipeline_mode<synchronous>, transform_indices = @transform_3, window_bounds = array<i64: 1, 384>}, {transform_indices = @transform_4, window_bounds = array<i64: 1, 4, 128, 32>}, {transform_indices = @transform_5, window_bounds = array<i64: 1, 4, 128, 32>}, {transform_indices = @transform_6, window_bounds = array<i64: 1, 4, 128, 32>}]} {
    %c0 = arith.constant 0 : index
    %c0_0 = arith.constant 0 : index
    %c0_1 = arith.constant 0 : index
    %0 = vector.load %arg2[%c0, %c0_0, %c0_1] : memref<1x128x128xf32, #tpu.memory_space<vmem>>, vector<1x128x128xf32>
    %1 = vector.shape_cast %0 : vector<1x128x128xf32> to vector<128x128xf32>
    %c0_2 = arith.constant 0 : index
    %c0_3 = arith.constant 0 : index
    %c0_4 = arith.constant 0 : index
    %2 = vector.load %arg3[%c0_2, %c0_3, %c0_4] : memref<1x6x128xf32, #tpu.memory_space<vmem>>, vector<1x1x128xf32>
    %3 = vector.shape_cast %2 : vector<1x1x128xf32> to vector<1x128xf32>
    %c0_5 = arith.constant 0 : index
    %c1 = arith.constant 1 : index
    %c0_6 = arith.constant 0 : index
    %4 = vector.load %arg3[%c0_5, %c1, %c0_6] : memref<1x6x128xf32, #tpu.memory_space<vmem>>, vector<1x1x128xf32>
    %5 = vector.shape_cast %4 : vector<1x1x128xf32> to vector<1x128xf32>
    %cst = arith.constant dense<0.000000e+00> : vector<128xf32>
    %6 = vector.multi_reduction <add>, %1, %cst [1] : vector<128x128xf32> to vector<128xf32>
    %7 = vector.shape_cast %6 : vector<128xf32> to vector<128x1xf32>
    %cst_7 = arith.constant 1.280000e+02 : f32
    %8 = vector.broadcast %cst_7 : f32 to vector<128x1xf32>
    %9 = arith.divf %7, %8 : vector<128x1xf32>
    %10 = vector.broadcast %9 : vector<128x1xf32> to vector<128x128xf32>
    %11 = arith.subf %1, %10 : vector<128x128xf32>
    %12 = arith.mulf %11, %11 : vector<128x128xf32>
    %cst_8 = arith.constant dense<0.000000e+00> : vector<128xf32>
    %13 = vector.multi_reduction <add>, %12, %cst_8 [1] : vector<128x128xf32> to vector<128xf32>
    %14 = vector.shape_cast %13 : vector<128xf32> to vector<128x1xf32>
    %cst_9 = arith.constant 1.280000e+02 : f32
    %15 = vector.broadcast %cst_9 : f32 to vector<128x1xf32>
    %16 = arith.divf %14, %15 : vector<128x1xf32>
    %cst_10 = arith.constant 9.99999997E-7 : f32
    %17 = vector.broadcast %cst_10 : f32 to vector<128x1xf32>
    %18 = arith.addf %16, %17 : vector<128x1xf32>
    %19 = math.rsqrt %18 : vector<128x1xf32>
    %20 = vector.broadcast %19 : vector<128x1xf32> to vector<128x128xf32>
    %21 = arith.mulf %11, %20 : vector<128x128xf32>
    %22 = vector.broadcast %5 : vector<1x128xf32> to vector<128x128xf32>
    %23 = arith.mulf %21, %22 : vector<128x128xf32>
    %24 = vector.broadcast %3 : vector<1x128xf32> to vector<128x128xf32>
    %25 = arith.addf %23, %24 : vector<128x128xf32>
    %26 = arith.truncf %25 : vector<128x128xf32> to vector<128x128xbf16>
    %c0_11 = arith.constant 0 : index
    %c0_12 = arith.constant 0 : index
    %27 = vector.load %arg4[%c0_11, %c0_12] : memref<128x384xbf16, #tpu.memory_space<vmem>>, vector<128x384xbf16>
    %cst_13 = arith.constant dense<0.000000e+00> : vector<128x384xf32>
    %28 = tpu.matmul %26, %27, %cst_13 {dimension_numbers = #tpu.dot_dimension_numbers<[1], [0], [0], [1], [0, 0, 1, 1], [], []>} : vector<128x128xbf16>, vector<128x384xbf16>, vector<128x384xf32> -> vector<128x384xf32>
    %c0_14 = arith.constant 0 : index
    %c0_15 = arith.constant 0 : index
    %29 = vector.load %arg5[%c0_14, %c0_15] : memref<1x384xf32, #tpu.memory_space<vmem>>, vector<1x384xf32>
    %30 = vector.broadcast %29 : vector<1x384xf32> to vector<128x384xf32>
    %31 = arith.addf %28, %30 : vector<128x384xf32>
    %32 = arith.truncf %31 : vector<128x384xf32> to vector<128x384xbf16>
    %33 = vector.extract_strided_slice %32 {offsets = [0, 0], sizes = [128, 32], strides = [1, 1]} : vector<128x384xbf16> to vector<128x32xbf16>
    %c0_16 = arith.constant 0 : index
    %c0_17 = arith.constant 0 : index
    %c0_18 = arith.constant 0 : index
    %c0_19 = arith.constant 0 : index
    %34 = vector.load %arg6[%c0_16, %c0_17, %c0_18, %c0_19] : memref<1x4x128x32xbf16, #tpu.memory_space<vmem>>, vector<1x1x128x32xbf16>
    %35 = vector.shape_cast %34 : vector<1x1x128x32xbf16> to vector<128x32xbf16>
    %36 = vector.shape_cast %33 : vector<128x32xbf16> to vector<1x1x128x32xbf16>
    tpu.vector_store %arg6[%c0_16, %c0_17, %c0_18, %c0_19], %36 {strides = array<i32>} : memref<1x4x128x32xbf16, #tpu.memory_space<vmem>>, vector<1x1x128x32xbf16>,
    %37 = vector.extract_strided_slice %32 {offsets = [0, 32], sizes = [128, 32], strides = [1, 1]} : vector<128x384xbf16> to vector<128x32xbf16>
    %c0_20 = arith.constant 0 : index
    %c1_21 = arith.constant 1 : index
    %c0_22 = arith.constant 0 : index
    %c0_23 = arith.constant 0 : index
    %38 = vector.load %arg6[%c0_20, %c1_21, %c0_22, %c0_23] : memref<1x4x128x32xbf16, #tpu.memory_space<vmem>>, vector<1x1x128x32xbf16>
    %39 = vector.shape_cast %38 : vector<1x1x128x32xbf16> to vector<128x32xbf16>
    %40 = vector.shape_cast %37 : vector<128x32xbf16> to vector<1x1x128x32xbf16>
    tpu.vector_store %arg6[%c0_20, %c1_21, %c0_22, %c0_23], %40 {strides = array<i32>} : memref<1x4x128x32xbf16, #tpu.memory_space<vmem>>, vector<1x1x128x32xbf16>,
    %41 = vector.extract_strided_slice %32 {offsets = [0, 64], sizes = [128, 32], strides = [1, 1]} : vector<128x384xbf16> to vector<128x32xbf16>
    %c0_24 = arith.constant 0 : index
    %c2 = arith.constant 2 : index
    %c0_25 = arith.constant 0 : index
    %c0_26 = arith.constant 0 : index
    %42 = vector.load %arg6[%c0_24, %c2, %c0_25, %c0_26] : memref<1x4x128x32xbf16, #tpu.memory_space<vmem>>, vector<1x1x128x32xbf16>
    %43 = vector.shape_cast %42 : vector<1x1x128x32xbf16> to vector<128x32xbf16>
    %44 = vector.shape_cast %41 : vector<128x32xbf16> to vector<1x1x128x32xbf16>
    tpu.vector_store %arg6[%c0_24, %c2, %c0_25, %c0_26], %44 {strides = array<i32>} : memref<1x4x128x32xbf16, #tpu.memory_space<vmem>>, vector<1x1x128x32xbf16>,
    %45 = vector.extract_strided_slice %32 {offsets = [0, 96], sizes = [128, 32], strides = [1, 1]} : vector<128x384xbf16> to vector<128x32xbf16>
    %c0_27 = arith.constant 0 : index
    %c3 = arith.constant 3 : index
    %c0_28 = arith.constant 0 : index
    %c0_29 = arith.constant 0 : index
    %46 = vector.load %arg6[%c0_27, %c3, %c0_28, %c0_29] : memref<1x4x128x32xbf16, #tpu.memory_space<vmem>>, vector<1x1x128x32xbf16>
    %47 = vector.shape_cast %46 : vector<1x1x128x32xbf16> to vector<128x32xbf16>
    %48 = vector.shape_cast %45 : vector<128x32xbf16> to vector<1x1x128x32xbf16>
    tpu.vector_store %arg6[%c0_27, %c3, %c0_28, %c0_29], %48 {strides = array<i32>} : memref<1x4x128x32xbf16, #tpu.memory_space<vmem>>, vector<1x1x128x32xbf16>,
    %49 = vector.extract_strided_slice %32 {offsets = [0, 128], sizes = [128, 32], strides = [1, 1]} : vector<128x384xbf16> to vector<128x32xbf16>
    %c0_30 = arith.constant 0 : index
    %c0_31 = arith.constant 0 : index
    %c0_32 = arith.constant 0 : index
    %c0_33 = arith.constant 0 : index
    %50 = vector.load %arg7[%c0_30, %c0_31, %c0_32, %c0_33] : memref<1x4x128x32xbf16, #tpu.memory_space<vmem>>, vector<1x1x128x32xbf16>
    %51 = vector.shape_cast %50 : vector<1x1x128x32xbf16> to vector<128x32xbf16>
    %52 = vector.shape_cast %49 : vector<128x32xbf16> to vector<1x1x128x32xbf16>
    tpu.vector_store %arg7[%c0_30, %c0_31, %c0_32, %c0_33], %52 {strides = array<i32>} : memref<1x4x128x32xbf16, #tpu.memory_space<vmem>>, vector<1x1x128x32xbf16>,
    %53 = vector.extract_strided_slice %32 {offsets = [0, 160], sizes = [128, 32], strides = [1, 1]} : vector<128x384xbf16> to vector<128x32xbf16>
    %c0_34 = arith.constant 0 : index
    %c1_35 = arith.constant 1 : index
    %c0_36 = arith.constant 0 : index
    %c0_37 = arith.constant 0 : index
    %54 = vector.load %arg7[%c0_34, %c1_35, %c0_36, %c0_37] : memref<1x4x128x32xbf16, #tpu.memory_space<vmem>>, vector<1x1x128x32xbf16>
    %55 = vector.shape_cast %54 : vector<1x1x128x32xbf16> to vector<128x32xbf16>
    %56 = vector.shape_cast %53 : vector<128x32xbf16> to vector<1x1x128x32xbf16>
    tpu.vector_store %arg7[%c0_34, %c1_35, %c0_36, %c0_37], %56 {strides = array<i32>} : memref<1x4x128x32xbf16, #tpu.memory_space<vmem>>, vector<1x1x128x32xbf16>,
    %57 = vector.extract_strided_slice %32 {offsets = [0, 192], sizes = [128, 32], strides = [1, 1]} : vector<128x384xbf16> to vector<128x32xbf16>
    %c0_38 = arith.constant 0 : index
    %c2_39 = arith.constant 2 : index
    %c0_40 = arith.constant 0 : index
    %c0_41 = arith.constant 0 : index
    %58 = vector.load %arg7[%c0_38, %c2_39, %c0_40, %c0_41] : memref<1x4x128x32xbf16, #tpu.memory_space<vmem>>, vector<1x1x128x32xbf16>
    %59 = vector.shape_cast %58 : vector<1x1x128x32xbf16> to vector<128x32xbf16>
    %60 = vector.shape_cast %57 : vector<128x32xbf16> to vector<1x1x128x32xbf16>
    tpu.vector_store %arg7[%c0_38, %c2_39, %c0_40, %c0_41], %60 {strides = array<i32>} : memref<1x4x128x32xbf16, #tpu.memory_space<vmem>>, vector<1x1x128x32xbf16>,
    %61 = vector.extract_strided_slice %32 {offsets = [0, 224], sizes = [128, 32], strides = [1, 1]} : vector<128x384xbf16> to vector<128x32xbf16>
    %c0_42 = arith.constant 0 : index
    %c3_43 = arith.constant 3 : index
    %c0_44 = arith.constant 0 : index
    %c0_45 = arith.constant 0 : index
    %62 = vector.load %arg7[%c0_42, %c3_43, %c0_44, %c0_45] : memref<1x4x128x32xbf16, #tpu.memory_space<vmem>>, vector<1x1x128x32xbf16>
    %63 = vector.shape_cast %62 : vector<1x1x128x32xbf16> to vector<128x32xbf16>
    %64 = vector.shape_cast %61 : vector<128x32xbf16> to vector<1x1x128x32xbf16>
    tpu.vector_store %arg7[%c0_42, %c3_43, %c0_44, %c0_45], %64 {strides = array<i32>} : memref<1x4x128x32xbf16, #tpu.memory_space<vmem>>, vector<1x1x128x32xbf16>,
    %65 = vector.extract_strided_slice %32 {offsets = [0, 256], sizes = [128, 32], strides = [1, 1]} : vector<128x384xbf16> to vector<128x32xbf16>
    %c0_46 = arith.constant 0 : index
    %c0_47 = arith.constant 0 : index
    %c0_48 = arith.constant 0 : index
    %c0_49 = arith.constant 0 : index
    %66 = vector.load %arg8[%c0_46, %c0_47, %c0_48, %c0_49] : memref<1x4x128x32xbf16, #tpu.memory_space<vmem>>, vector<1x1x128x32xbf16>
    %67 = vector.shape_cast %66 : vector<1x1x128x32xbf16> to vector<128x32xbf16>
    %68 = vector.shape_cast %65 : vector<128x32xbf16> to vector<1x1x128x32xbf16>
    tpu.vector_store %arg8[%c0_46, %c0_47, %c0_48, %c0_49], %68 {strides = array<i32>} : memref<1x4x128x32xbf16, #tpu.memory_space<vmem>>, vector<1x1x128x32xbf16>,
    %69 = vector.extract_strided_slice %32 {offsets = [0, 288], sizes = [128, 32], strides = [1, 1]} : vector<128x384xbf16> to vector<128x32xbf16>
    %c0_50 = arith.constant 0 : index
    %c1_51 = arith.constant 1 : index
    %c0_52 = arith.constant 0 : index
    %c0_53 = arith.constant 0 : index
    %70 = vector.load %arg8[%c0_50, %c1_51, %c0_52, %c0_53] : memref<1x4x128x32xbf16, #tpu.memory_space<vmem>>, vector<1x1x128x32xbf16>
    %71 = vector.shape_cast %70 : vector<1x1x128x32xbf16> to vector<128x32xbf16>
    %72 = vector.shape_cast %69 : vector<128x32xbf16> to vector<1x1x128x32xbf16>
    tpu.vector_store %arg8[%c0_50, %c1_51, %c0_52, %c0_53], %72 {strides = array<i32>} : memref<1x4x128x32xbf16, #tpu.memory_space<vmem>>, vector<1x1x128x32xbf16>,
    %73 = vector.extract_strided_slice %32 {offsets = [0, 320], sizes = [128, 32], strides = [1, 1]} : vector<128x384xbf16> to vector<128x32xbf16>
    %c0_54 = arith.constant 0 : index
    %c2_55 = arith.constant 2 : index
    %c0_56 = arith.constant 0 : index
    %c0_57 = arith.constant 0 : index
    %74 = vector.load %arg8[%c0_54, %c2_55, %c0_56, %c0_57] : memref<1x4x128x32xbf16, #tpu.memory_space<vmem>>, vector<1x1x128x32xbf16>
    %75 = vector.shape_cast %74 : vector<1x1x128x32xbf16> to vector<128x32xbf16>
    %76 = vector.shape_cast %73 : vector<128x32xbf16> to vector<1x1x128x32xbf16>
    tpu.vector_store %arg8[%c0_54, %c2_55, %c0_56, %c0_57], %76 {strides = array<i32>} : memref<1x4x128x32xbf16, #tpu.memory_space<vmem>>, vector<1x1x128x32xbf16>,
    %77 = vector.extract_strided_slice %32 {offsets = [0, 352], sizes = [128, 32], strides = [1, 1]} : vector<128x384xbf16> to vector<128x32xbf16>
    %c0_58 = arith.constant 0 : index
    %c3_59 = arith.constant 3 : index
    %c0_60 = arith.constant 0 : index
    %c0_61 = arith.constant 0 : index
    %78 = vector.load %arg8[%c0_58, %c3_59, %c0_60, %c0_61] : memref<1x4x128x32xbf16, #tpu.memory_space<vmem>>, vector<1x1x128x32xbf16>
    %79 = vector.shape_cast %78 : vector<1x1x128x32xbf16> to vector<128x32xbf16>
    %80 = vector.shape_cast %77 : vector<128x32xbf16> to vector<1x1x128x32xbf16>
    tpu.vector_store %arg8[%c0_58, %c3_59, %c0_60, %c0_61], %80 {strides = array<i32>} : memref<1x4x128x32xbf16, #tpu.memory_space<vmem>>, vector<1x1x128x32xbf16>,
    return
  }
  func.func @transform_0(%arg0: i32, %arg1: i32) -> (i32, i32, i32) {
    %c0_i32 = arith.constant 0 : i32
    %c0_i32_0 = arith.constant 0 : i32
    return %arg0, %arg1, %c0_i32 : i32, i32, i32
  }
  func.func @transform_1(%arg0: i32, %arg1: i32) -> (i32, i32, i32) {
    %c0_i32 = arith.constant 0 : i32
    %c0_i32_0 = arith.constant 0 : i32
    %c0_i32_1 = arith.constant 0 : i32
    return %arg0, %c0_i32, %c0_i32_0 : i32, i32, i32
  }
  func.func @transform_2(%arg0: i32, %arg1: i32) -> (i32, i32) {
    %c0_i32 = arith.constant 0 : i32
    %c0_i32_0 = arith.constant 0 : i32
    %c0_i32_1 = arith.constant 0 : i32
    return %c0_i32, %c0_i32_0 : i32, i32
  }
  func.func @transform_3(%arg0: i32, %arg1: i32) -> (i32, i32) {
    %c0_i32 = arith.constant 0 : i32
    %c0_i32_0 = arith.constant 0 : i32
    %c0_i32_1 = arith.constant 0 : i32
    return %c0_i32, %c0_i32_0 : i32, i32
  }
  func.func @transform_4(%arg0: i32, %arg1: i32) -> (i32, i32, i32, i32) {
    %c0_i32 = arith.constant 0 : i32
    %c0_i32_0 = arith.constant 0 : i32
    %c0_i32_1 = arith.constant 0 : i32
    return %arg0, %c0_i32, %arg1, %c0_i32_0 : i32, i32, i32, i32
  }
  func.func @transform_5(%arg0: i32, %arg1: i32) -> (i32, i32, i32, i32) {
    %c0_i32 = arith.constant 0 : i32
    %c0_i32_0 = arith.constant 0 : i32
    %c0_i32_1 = arith.constant 0 : i32
    return %arg0, %c0_i32, %arg1, %c0_i32_0 : i32, i32, i32, i32
  }
  func.func @transform_6(%arg0: i32, %arg1: i32) -> (i32, i32, i32, i32) {
    %c0_i32 = arith.constant 0 : i32
    %c0_i32_0 = arith.constant 0 : i32
    %c0_i32_1 = arith.constant 0 : i32
    return %arg0, %c0_i32, %arg1, %c0_i32_0 : i32, i32, i32, i32
  }
}

</mosaic_0001>

<bundles_post_ra>
// kernel: tpu_custom_call.1
= control target key start
LH: loop header
LB: loop body
LE: loop exit
PB: predicated region body
PF: predicated region fallthrough
CT: control target
= control target key end

     0   :  { %s5016_s0 = inlined_call_operand.hbm [shape: f32[2,256,128], index: 0, kind: input, shape index: {}]   ;;  %s5017_s1 = inlined_call_operand.vmem [shape: f32[2,6,128], index: 1, kind: input, shape index: {}]   ;;  %s5018_s2 = inlined_call_operand.hbm [shape: bf16[128,384], index: 2, kind: input, shape index: {}]   ;;  %s5019_s3 = inlined_call_operand.vmem [shape: f32[1,384], index: 3, kind: input, shape index: {}]   ;;  %s5020_s4 = inlined_call_operand.vmem [shape: bf16[2,4,256,32], index: 4, kind: output, shape index: {0}]   ;;  %s5021_s5 = inlined_call_operand.vmem [shape: bf16[2,4,256,32], index: 5, kind: output, shape index: {1}]   ;;  %s5022_s6 = inlined_call_operand.vmem [shape: bf16[2,4,256,32], index: 6, kind: output, shape index: {2}]  }
   0x1   :  { %5028 = sst [smem:[#allocation13_spill]] %s5018_s2 }
   0x2   :  { %5029 = sst [smem:[#allocation14_spill]] %s5020_s4 }
   0x3   :  { %5030 = sst [smem:[#allocation15_spill]] %s5021_s5 }
   0x4   :  { %5031 = sst [smem:[#allocation16_spill]] %s5022_s6 }
   0x5   :  { %12 = vsyncpa [#allocation3], 0 }
   0x6   :  { %14 = vsyncpa [#allocation3 + $0x1], 0 }
   0x7   :  { %15 = vsyncpa [#allocation5], 0  ;;  %s3539_s21 = smov 0   ;;  %s3541_s22 = smov 0  }
   0x8   :  { %s3543_s23 = smov 0   ;;  %s3545_s24 = smov 0  }
   0x9   :  { %s3547_s25 = smov 0   ;;  %s3549_s26 = smov 0  }
   0xa   :  { %s3551_s27 = smov 0   ;;  %s3553_s28 = smov 0  }
   0xb LB: > { %5032 = sst [smem:[#allocation11_spill]] %s3476_s24  ;;  %s2866_s29 = sadd.s32 4294967295, %s3492_s28   ;;  %s3492_s28 = sphi %s3553_s28, %s21_s28   ;;  %s3488_s27 = sphi %s3551_s27, %s5060_s27   ;;  %s3484_s26 = sphi %s3549_s26, %s5059_s26   ;;  %s3480_s25 = sphi %s3547_s25, %s5058_s25   ;;  %s3476_s24 = sphi %s3545_s24, %s5057_s24   ;;  %s3472_s23 = sphi %s3543_s23, %s5056_s23   ;;  %s3468_s22 = sphi %s3541_s22, %s5055_s22   ;;  %s3464_s21 = sphi %s3539_s21, %s5054_s21  }
   0xc   : > { %p55_p0 = scmp.ne.s32.totalorder %s3468_s22, %s3464_s21  ;;  %p3579_p1 = scmp.eq.s32.totalorder %s2866_s29, 0 }
   0xd   : > { %p3583_p2 = scmp.eq.s32.totalorder %s2866_s29, 3  ;;  %p2868_p3 = scmp.ge.s32.totalorder %s3492_s28, 1 }
   0xe   : > { %s5033_s30 = scalar_select %p3579_p1, 1, 0 }
   0xf   : > { %s5034_s7 = scalar_select %p3583_p2, 1, 0 }
  0x10   : > { %p218_p4 = scmp.lt.s32.totalorder %s3492_s28, 5  ;;  %p3591_p5 = por %p3579_p1, %p55_p0 }
  0x11   : > { %s3494_s10 = smov [#allocation4]   ;;  %s5038_s2 = sld [smem:[#allocation13_spill]] }
  0x12   : > { %s5035_s8 = scalar_select %p3591_p5, 1, 0 }
  0x13   : > { %p3595_p6 = pnand %p2868_p3, %p218_p4  ;;  %s230_s11 = sshll.u32 %s3494_s10, 4  ;;  %s231_s11 = int_to_ptr.vmem [resolvable:$true] %s230_s11 }
  0x15   : > { %s5036_s9 = scalar_select %p3595_p6, 1, 0 }
  0x16   : > { %p3216_p7 = pneg %p3595_p6 }
  0x17   : > { %s3364_s15 = scalar_lea.hbm %s5038_s2, 3072 }
  0x18   : > { %p3603_p8 = pnand %p3216_p7, %p3579_p1  ;;  %p3365_p9 = scmp.ne.s32.totalorder %s5038_s2, %s3364_s15 }
  0x19   : > { %p3371_p13 = scmp.lt.u32.totalorder %s3364_s15, %s5038_s2 }
  0x1a   : > { %p3366_p10 = pneg %p3603_p8 }
  0x1c   : > { %p3367_p11 = pnand %p3366_p10, %p3365_p9 }
  0x1e   : > { %p3368_p12 = pneg %p3367_p11 }
  0x20   : > { %p3373_p0 = pnand %p3371_p13, %p3368_p12 }
  0x22   : > { %3376 = shalt.err (!%p3373_p0)
}
  0x23   : > { %s3377_s20 = scalar_lea.vmem %s231_s11, 3072  ;;  %p3385_p1 = scmp.lt.s32.totalorder %s231_s11, %s231_s11 }
  0x24   : > { %p3378_p3 = scmp.ne.s32.totalorder %s231_s11, %s3377_s20  ;;  %p3386_p5 = scmp.lt.s32.totalorder %s3377_s20, %s3377_s20 }
  0x26   : > { %p3380_p4 = pnand %p3378_p3, %p3366_p10  ;;  %p3387_p6 = por %p3386_p5, %p3385_p1 }
  0x28   : > { %p3381_p7 = pneg %p3380_p4 }
  0x2a   : > { %p3388_p2 = pnand %p3387_p6, %p3381_p7 }
  0x2c   : > { %3391 = shalt.err (!%p3388_p2)
}
  0x2d   : > { %s3495_s21 = smov 192   ;;  %s3496_s29 = smov 12  }
  0x2e   : > { %3219 = dma.hbm_to_vmem [thread:$0]  (!%p3603_p8), %s5038_s2, 3072, %s231_s11, [#allocation5], %s3495_s21, %s3495_s21, %s3496_s29  }
  0x2f   : > { %s30_s14 = sadd.s32 1, %s3484_s26  ;;  %s33_s15 = sadd.s32 1, %s3488_s27 }
  0x30   : > { %p31_p1 = scmp.ge.s32.totalorder %s30_s14, 2  ;;  %s42_s16 = sadd.s32 1, %s3472_s23 }
  0x31   : > { %p49_p2 = scmp.ne.s32.totalorder %s3472_s23, %s3468_s22  ;;  %p50_p5 = scmp.eq.s32.totalorder %s3492_s28, 0 }
  0x32   : > { %s5062_s14 = smov (%p31_p1, %s30_s14), 0  ;;  %s5064_s15 = smov (!%p31_p1, %s33_s15), %s3488_s27 }
  0x33   : > { %5039 = sst [smem:[#allocation12_spill]] %s5062_s14  ;;  %s38_s17 = ssub.s32 %s3484_s26, %s5062_s14 }
  0x34   : > { %p3634_p6 = por %p50_p5, %p49_p2  ;;  %p35_p8 = scmp.ge.s32.totalorder %s5064_s15, 2 }
  0x35   : > { %p5041_p9 = scmp.ne.s32.totalorder %s5034_s7, 0  ;;  %p3225_p11 = scmp.lt.s32.totalorder %s3492_s28, 4 }
  0x36   : > { %s247_s18 = sand.u32 1, %s3472_s23   ;;  %s5066_s15 = smov (%p35_p8, %s5064_s15), 0 }
  0x37   : > { %p3640_p10 = por %p5041_p9, %p49_p2  ;;  %s2871_s19 = sshll.u32 %s247_s18, 7 }
  0x38   : > { %s37_s20 = ssub.s32 %s3488_s27, %s5066_s15  ;;  %s2872_s29 = sshll.u32 %s3484_s26, 4 }
  0x39   : > { %s39_s21 = sor.u32 %s38_s17, %s37_s20  ;;  %s2873_s10 = sshll.u32 %s3488_s27, 5 }
  0x3a   : > { %p40_p12 = scmp.eq.s32.totalorder %s39_s21, 0  ;;  %s257_s13 = sadd.s32 %s2873_s10, %s2872_s29 }
  0x3b   : > { %s251_s2 = scalar_lea.vmem [#allocation2], %s2871_s19  ;;  %s2874_s6 = sshll.u32 %s257_s13, 7 }
  0x3c   : > { %s260_s7 = sshll.u32 %s251_s2, 4  ;;  %s3660_s24 = scalar_lea.hbm %s5016_s0, %s2874_s6  ;;  %s3655_s7 = int_to_ptr.vmem [resolvable:$true] %s260_s7 }
  0x3d   : > { %s3653_s14 = scalar_select %p40_p12, %s3472_s23, %s42_s16  }
  0x3e   : > { %p3666_p13 = pnand %p3225_p11, %p3634_p6  ;;  %s3670_s2 = scalar_lea.sflag [#allocation3], %s247_s18 }
  0x3f   : > { %s3392_s16 = scalar_lea.hbm %s3660_s24, 2048  ;;  %s3397_s6 = scalar_lea.hbm %s5016_s0, 8192 }
  0x40   : > { %p3393_p0 = scmp.ne.s32.totalorder %s3660_s24, %s3392_s16  ;;  %p3394_p3 = pneg %p3666_p13 }
  0x41   : > { %p3398_p1 = scmp.lt.u32.totalorder %s3660_s24, %s5016_s0  ;;  %p3399_p2 = scmp.lt.u32.totalorder %s3397_s6, %s3392_s16 }
  0x42   : > { %p3395_p4 = pnand %p3394_p3, %p3393_p0  ;;  %p3401_p6 = scmp.lt.u32.totalorder %s3392_s16, %s3660_s24 }
  0x43   : > { %p3400_p5 = por %p3399_p2, %p3398_p1 }
  0x44   : > { %p3396_p7 = pneg %p3395_p4 }
  0x45   : > { %p3402_p8 = por %p3401_p6, %p3400_p5 }
  0x47   : > { %p3403_p9 = pnand %p3402_p8, %p3396_p7 }
  0x49   : > { %3406 = shalt.err (!%p3403_p9)
}
  0x4a   : > { %s3407_s18 = scalar_lea.vmem %s3655_s7, 2048  ;;  %s3497_s20 = smov [#allocation2]  }
  0x4b   : > { %p3408_p11 = scmp.ne.s32.totalorder %s3655_s7, %s3407_s18  ;;  %s3412_s21 = sshll.u32 %s3497_s20, 4  ;;  %s3413_s21 = int_to_ptr.vmem [resolvable:$false] %s3412_s21 }
  0x4c   : > { %s3414_s29 = scalar_lea.vmem %s3413_s21, 4096  ;;  %p3415_p4 = scmp.lt.s32.totalorder %s3655_s7, %s3413_s21 }
  0x4d   : > { %p3410_p12 = pnand %p3408_p11, %p3394_p3  ;;  %p3416_p1 = scmp.lt.s32.totalorder %s3414_s29, %s3407_s18 }
  0x4f   : > { %p3411_p0 = pneg %p3410_p12  ;;  %p3417_p2 = por %p3416_p1, %p3415_p4 }
  0x51   : > { %p3418_p5 = pnand %p3417_p2, %p3411_p0 }
  0x53   : > { %3421 = shalt.err (!%p3418_p5)
}
  0x54   : > { %s3498_s10 = smov 128   ;;  %s3499_s13 = smov 8  }
  0x55   : > { %3223 = dma.hbm_to_vmem [thread:$0]  (!%p3666_p13), %s3660_s24, 2048, %s3655_s7, %s3670_s2, %s3498_s10, %s3498_s10, %s3499_s13  }
  0x56   : > { %p5044_p3 = scmp.ne.s32.totalorder %s5036_s9, 0 }
  0x57   : > { %s3701_s16 = sand.u32 (!%p5044_p3), 1, %s3468_s22   ;;  %p5045_p7 = scmp.ne.s32.totalorder (!%p5044_p3), %s5035_s8, 0 }
  0x58   : > { %279 = sbr.rel (%p5044_p3) target bundleno = 1091 (0x443), region = 36  ;;  %s2876_s4 = sshll.u32 (!%p5044_p3), %s3701_s16, 7 }
  0x59   : > { %s282_s5 = scalar_lea.sflag (!%p5044_p3), [#allocation3], %s3701_s16  ;;  %s3705_s6 = scalar_lea.vmem (!%p5044_p3), [#allocation2], %s2876_s4 }
  0x5f   : > { %3455 = dma.done.wait (%p5045_p7), %s282_s5, 2048  }
  0x60   : > { %3457 = vsyncadd (%p5045_p7), %s282_s5, 4294965248  ;;  %p5046_p13 = scmp.ne.s32.totalorder %s5033_s30, 0 }
  0x62   : > { %3459 = dma.done.wait (%p5046_p13), [#allocation5], 3072  }
  0x63   : > { %3461 = vsyncadd (%p5046_p13), [#allocation5], 4294964224  ;;  %v338_v0 = vld [vmem:[%s3705_s6] sm:$0xff]  ;;  %v340_v1 = vld [vmem:[%s3705_s6 + $0x10] sm:$0xff]  ;;  %p330_p6 = scmp.lt.s32.totalorder %s3480_s25, 1  ;;  %s3908_s12 = sshll.u32 %s3701_s16, 8 }
  0x64   : > { %356 = vadd.xlane.f32.xlu0 %v338_v0  ;;  %360 = vadd.xlane.f32.xlu1 %v340_v1  ;;  %v339_v2 = vld [vmem:[%s3705_s6 + $0x8] sm:$0xff]  ;;  %v341_v3 = vld [vmem:[%s3705_s6 + $0x18] sm:$0xff]  ;;  %v342_v4 = vld [vmem:[%s3705_s6 + $0x20] sm:$0xff]  ;;  %vm1048_vm0 = vcmask 257024   ;;  %s3919_s19 = scalar_lea.vmem [#allocation6], %s3908_s12  ;;  %s3501_s18 = smov 96  }
  0x65   : > { %v343_v5 = vld [vmem:[%s3705_s6 + $0x28] sm:$0xff]  ;;  %v3722_v6 = vld [vmem:[%s3705_s6 + $0x30] sm:$0xff]  ;;  %v3725_v7 = vld [vmem:[%s3705_s6 + $0x38] sm:$0xff]  ;;  %s331_s24 = scalar_select %p330_p6, %s3480_s25, 1 }
  0x66   : > { %v3728_v8 = vld [vmem:[%s3705_s6 + $0x40] sm:$0xff]  ;;  %v3731_v9 = vld [vmem:[%s3705_s6 + $0x48] sm:$0xff]  ;;  %v3738_v10 = vld [vmem:[%s3705_s6 + $0x50] sm:$0xff]  ;;  %s3926_s20 = scalar_lea.vmem [#allocation7], %s3908_s12  ;;  %s3947_s21 = scalar_lea.vmem [#allocation8], %s3908_s12 }
  0x67   : > { %v3741_v11 = vld [vmem:[%s3705_s6 + $0x58] sm:$0xff]  ;;  %v3746_v12 = vld [vmem:[%s3705_s6 + $0x60] sm:$0xff]  ;;  %v3749_v13 = vld [vmem:[%s3705_s6 + $0x68] sm:$0xff]  ;;  %s2881_s30 = sshll.u32 %s331_s24, 3  ;;  %s3502_s29 = smov 64  }
  0x68   : > { %358 = vadd.xlane.f32.xlu0 %v339_v2  ;;  %362 = vadd.xlane.f32.xlu1 %v341_v3  ;;  %v3754_v14 = vld [vmem:[%s3705_s6 + $0x70] sm:$0xff]  ;;  %v3757_v15 = vld [vmem:[%s3705_s6 + $0x78] sm:$0xff]  ;;  %v3302_v17 = vld [vmem:[#allocation4] ss:$12 sps:$4 sm:$0xff]   ;;  %s333_s7 = scalar_lea.vmem %s5017_s1, %s2881_s30  ;;  %s3503_s10 = smov 32  }
  0x69   : > { %v3300_v16 = vld [vmem:[#allocation4 + $0x4] ss:$12 sps:$4 sm:$0xff]   ;;  %v3303_v18 = vld [vmem:[#allocation4 + $0x1c] ss:$12 sps:$4 sm:$0xff]   ;;  %s5047_s13 = sld [smem:[#allocation11_spill]] (%p3640_p10)  ;;  %s3104_s4 = sshll.u32 (%p3640_p10), %s3480_s25, 7 }
  0x6a   : > { %v3305_v19 = vld [vmem:[#allocation4 + $0x8] ss:$12 sps:$4 sm:$0xff]   ;;  %758 = vmatprep.subr.bf16.mxu0 %v3300_v16  ;;  %v3306_v58 = vld [vmem:[#allocation4 + $0x18] ss:$12 sps:$4 sm:$0xff]   ;;  %s5048_s8 = sld [smem:[#allocation14_spill]] (%p3640_p10) }
  0x6b   : > { %759 = vmatpush1.bf16.msra.mxu0 %v3302_v17  ;;  %3178 = vmatprep.subr.bf16.mxu1 %v3305_v19 }
  0x6c   : > { %364 = vadd.xlane.f32.xlu0 %v342_v4  ;;  %366 = vadd.xlane.f32.xlu1 %v343_v5 }
  0x6d   : > { %760 = vmatprep.subr.bf16.mxu0 %v3303_v18  ;;  %3179 = vmatpush3.bf16.msra.mxu1 %v3305_v19  ;;  %v3311_v18 = vld [vmem:[#allocation4 + $0x4c] ss:$12 sps:$4 sm:$0xff]  }
  0x6e   : > { %v3313_v19 = vld [vmem:[#allocation4 + $0x38] ss:$12 sps:$4 sm:$0xff]  }
  0x6f   : > { %761 = vmatpush1.bf16.msra.mxu0 %v3306_v58  ;;  %s3103_s16 = sshll.u32 (%p3640_p10), %s5047_s13, 4 }
  0x70   : > { %368 = vadd.xlane.f32.xlu0 %v3722_v6  ;;  %370 = vadd.xlane.f32.xlu1 %v3725_v7  ;;  %s1811_s5 = sadd.s32 (%p3640_p10), %s3104_s4, %s3103_s16 }
  0x71   : > { %s3105_s6 = sshll.u32 (%p3640_p10), %s1811_s5, 2 }
  0x72   : > { %s4789_s9 = scalar_lea.vmem (%p3640_p10), %s5048_s8, %s3105_s6 }
  0x74   : > { %372 = vadd.xlane.f32.xlu0 %v3728_v8  ;;  %374 = vadd.xlane.f32.xlu1 %v3731_v9 }
  0x78   : > { %376 = vadd.xlane.f32.xlu0 %v3738_v10  ;;  %378 = vadd.xlane.f32.xlu1 %v3741_v11 }
  0x7c   : > { %380 = vadd.xlane.f32.xlu0 %v3746_v12  ;;  %382 = vadd.xlane.f32.xlu1 %v3749_v13 }
  0x80   : > { %384 = vadd.xlane.f32.xlu0 %v3754_v14  ;;  %386 = vadd.xlane.f32.xlu1 %v3757_v15 }
  0xf1   : > { %v357_v20 = vpop.xlane.xlu0 %356  ;;  %v361_v21 = vpop.xlane.xlu1 %360 }
  0xf2   : > { %v389_v22 = vmul.f32 0.0078125, %v357_v20  ;;  %v391_v23 = vmul.f32 0.0078125, %v361_v21 }
  0xf4   : > { %v3761_v24 = vsub.f32 %v338_v0, %v389_v22  ;;  %v3763_v25 = vsub.f32 %v340_v1, %v391_v23  ;;  %v3307_v0 = vld [vmem:[#allocation4 + $0x34] ss:$12 sps:$4 sm:$0xff]  }
  0xf5   : > { %v359_v26 = vpop.xlane.xlu0 %358  ;;  %v363_v27 = vpop.xlane.xlu1 %362  ;;  %v3309_v1 = vld [vmem:[#allocation4 + $0x20] ss:$12 sps:$4 sm:$0xff]   ;;  %762 = vmatprep.subr.bf16.mxu0 %v3307_v0  ;;  %v3314_v22 = vld [vmem:[#allocation4 + $0x48] ss:$12 sps:$4 sm:$0xff]  }
  0xf6   : > { %v390_v28 = vmul.f32 0.0078125, %v359_v26  ;;  %v421_v29 = vmul.f32 %v3761_v24, %v3761_v24  ;;  %v392_v30 = vmul.f32 0.0078125, %v363_v27  ;;  %v423_v31 = vmul.f32 %v3763_v25, %v3763_v25  ;;  %3180 = vmatprep.subr.bf16.mxu1 %v3309_v1 }
  0xf7   : > { %3181 = vmatpush3.bf16.msra.mxu1 %v3309_v1 }
  0xf8   : > { %437 = vadd.xlane.f32.xlu0 %v421_v29  ;;  %v3769_v32 = vsub.f32 %v339_v2, %v390_v28  ;;  %v3771_v33 = vsub.f32 %v341_v3, %v392_v30  ;;  %3182 = vmatprep.subr.bf16.mxu1 %v3313_v19  ;;  %v3315_v29 = vld [vmem:[#allocation4 + $0x64] ss:$12 sps:$4 sm:$0xff]  }
  0xf9   : > { %v365_v34 = vpop.xlane.xlu0 %364  ;;  %v367_v35 = vpop.xlane.xlu1 %366  ;;  %v3317_v30 = vld [vmem:[#allocation4 + $0x50] ss:$12 sps:$4 sm:$0xff]  }
  0xfa   : > { %v393_v36 = vmul.f32 0.0078125, %v365_v34  ;;  %v422_v37 = vmul.f32 %v3769_v32, %v3769_v32  ;;  %v394_v38 = vmul.f32 0.0078125, %v367_v35  ;;  %v424_v39 = vmul.f32 %v3771_v33, %v3771_v33 }
  0xfb   : > { %3183 = vmatpush3.bf16.msra.mxu1 %v3313_v19 }
  0xfc   : > { %441 = vadd.xlane.f32.xlu0 %v423_v31  ;;  %439 = vadd.xlane.f32.xlu1 %v422_v37  ;;  %v3777_v40 = vsub.f32 %v342_v4, %v393_v36  ;;  %v3779_v41 = vsub.f32 %v343_v5, %v394_v38  ;;  %v3318_v31 = vld [vmem:[#allocation4 + $0x60] ss:$12 sps:$4 sm:$0xff]   ;;  %v3321_v36 = vld [vmem:[#allocation4 + $0x68] ss:$12 sps:$4 sm:$0xff]   ;;  %v3322_v37 = vld [vmem:[#allocation4 + $0x78] ss:$12 sps:$4 sm:$0xff]  }
  0xfd   : > { %v369_v42 = vpop.xlane.xlu0 %368  ;;  %v371_v43 = vpop.xlane.xlu1 %370  ;;  %3184 = vmatprep.subr.bf16.mxu1 %v3317_v30  ;;  %v3325_v38 = vld [vmem:[#allocation4 + $0x80] ss:$12 sps:$4 sm:$0xff]  }
  0xfe   : > { %v395_v44 = vmul.f32 0.0078125, %v369_v42  ;;  %v425_v45 = vmul.f32 %v3777_v40, %v3777_v40  ;;  %v396_v46 = vmul.f32 0.0078125, %v371_v43  ;;  %v426_v47 = vmul.f32 %v3779_v41, %v3779_v41  ;;  %v3327_v42 = vld [vmem:[#allocation4 + $0xac] ss:$12 sps:$4 sm:$0xff]  }
  0xff   : > { %3185 = vmatpush3.bf16.msra.mxu1 %v3317_v30  ;;  %v3329_v43 = vld [vmem:[#allocation4 + $0x98] ss:$12 sps:$4 sm:$0xff]  }
 0x100   : > { %443 = vadd.xlane.f32.xlu1 %v424_v39  ;;  %445 = vadd.xlane.f32.xlu0 %v425_v45  ;;  %v3786_v48 = vsub.f32 %v3722_v6, %v395_v44  ;;  %v3789_v49 = vsub.f32 %v3725_v7, %v396_v46  ;;  %v3310_v7 = vld [vmem:[#allocation4 + $0x30] ss:$12 sps:$4 sm:$0xff]   ;;  %v3330_v44 = vld [vmem:[#allocation4 + $0xa8] ss:$12 sps:$4 sm:$0xff]   ;;  %v3500_v46 = vmov 0  }
 0x101   : > { %v373_v50 = vpop.xlane.xlu0 %372  ;;  %v375_v51 = vpop.xlane.xlu1 %374  ;;  %763 = vmatpush1.bf16.msra.mxu0 %v3310_v7  ;;  %3186 = vmatprep.subr.bf16.mxu1 %v3321_v36  ;;  %v3326_v39 = vld [vmem:[#allocation4 + $0x90] ss:$12 sps:$4 sm:$0xff]  }
 0x102   : > { %v397_v52 = vmul.f32 0.0078125, %v373_v50  ;;  %v427_v53 = vmul.f32 %v3786_v48, %v3786_v48  ;;  %v398_v54 = vmul.f32 0.0078125, %v375_v51  ;;  %v428_v55 = vmul.f32 %v3789_v49, %v3789_v49  ;;  %764 = vmatprep.subr.bf16.mxu0 %v3311_v18  ;;  %v3331_v45 = vld [vmem:[#allocation4 + $0xb0] ss:$12 sps:$4 sm:$0xff]   ;;  %790 = vmatprep.mubr.bf16.mxu0 %v3500_v46 }
 0x103   : > { %3187 = vmatpush3.bf16.msra.mxu1 %v3321_v36 }
 0x104   : > { %447 = vadd.xlane.f32.xlu1 %v426_v47  ;;  %449 = vadd.xlane.f32.xlu0 %v427_v53  ;;  %v3796_v56 = vsub.f32 %v3728_v8, %v397_v52  ;;  %v3799_v57 = vsub.f32 %v3731_v9, %v398_v54 }
 0x105   : > { %v377_v59 = vpop.xlane.xlu0 %376  ;;  %v379_v60 = vpop.xlane.xlu1 %378  ;;  %765 = vmatpush1.bf16.msra.mxu0 %v3314_v22  ;;  %3188 = vmatprep.subr.bf16.mxu1 %v3325_v38  ;;  %v3842_v22 = vld [vmem:[%s333_s7 + $0x1] ss:$0 sm:$0xff] }
 0x106   : > { %v399_v61 = vmul.f32 0.0078125, %v377_v59  ;;  %v429_v62 = vmul.f32 %v3796_v56, %v3796_v56  ;;  %v400_v63 = vmul.f32 0.0078125, %v379_v60  ;;  %v430_v2 = vmul.f32 %v3799_v57, %v3799_v57  ;;  %766 = vmatprep.subr.bf16.mxu0 %v3315_v29 }
 0x107   : > { %3189 = vmatpush3.bf16.msra.mxu1 %v3325_v38 }
 0x108   : > { %451 = vadd.xlane.f32.xlu1 %v428_v55  ;;  %453 = vadd.xlane.f32.xlu0 %v429_v62  ;;  %v3806_v3 = vsub.f32 %v3738_v10, %v399_v61  ;;  %v3809_v4 = vsub.f32 %v3741_v11, %v400_v63 }
 0x109   : > { %v381_v5 = vpop.xlane.xlu0 %380  ;;  %v383_v6 = vpop.xlane.xlu1 %382  ;;  %767 = vmatpush1.bf16.msra.mxu0 %v3318_v31  ;;  %3190 = vmatprep.subr.bf16.mxu1 %v3329_v43 }
 0x10a   : > { %v401_v8 = vmul.f32 0.0078125, %v381_v5  ;;  %v431_v9 = vmul.f32 %v3806_v3, %v3806_v3  ;;  %v402_v16 = vmul.f32 0.0078125, %v383_v6  ;;  %v432_v10 = vmul.f32 %v3809_v4, %v3809_v4 }
 0x10b   : > { %3191 = vmatpush3.bf16.msra.mxu1 %v3329_v43 }
 0x10c   : > { %455 = vadd.xlane.f32.xlu1 %v430_v2  ;;  %457 = vadd.xlane.f32.xlu0 %v431_v9  ;;  %v3816_v11 = vsub.f32 %v3746_v12, %v401_v8  ;;  %v3819_v17 = vsub.f32 %v3749_v13, %v402_v16 }
 0x10d   : > { %v385_v20 = vpop.xlane.xlu0 %384  ;;  %v387_v21 = vpop.xlane.xlu1 %386  ;;  %3192 = vmatprep.subr.bf16.mxu1 %v3331_v45 }
 0x10e   : > { %v403_v23 = vmul.f32 0.0078125, %v385_v20  ;;  %v433_v26 = vmul.f32 %v3816_v11, %v3816_v11  ;;  %v404_v27 = vmul.f32 0.0078125, %v387_v21  ;;  %v434_v12 = vmul.f32 %v3819_v17, %v3819_v17 }
 0x10f   : > { %3193 = vmatpush3.bf16.msra.mxu1 %v3331_v45 }
 0x110   : > { %459 = vadd.xlane.f32.xlu1 %v432_v10  ;;  %461 = vadd.xlane.f32.xlu0 %v433_v26  ;;  %v3826_v13 = vsub.f32 %v3754_v14, %v403_v23  ;;  %v3829_v28 = vsub.f32 %v3757_v15, %v404_v27  ;;  %v3319_v14 = vld [vmem:[#allocation4 + $0x7c] ss:$12 sps:$4 sm:$0xff]   ;;  %v3323_v15 = vld [vmem:[#allocation4 + $0x94] ss:$12 sps:$4 sm:$0xff]  }
 0x111   : > { %768 = vmatprep.subr.bf16.mxu0 %v3319_v14 }
 0x112   : > { %v435_v34 = vmul.f32 %v3826_v13, %v3826_v13  ;;  %v436_v35 = vmul.f32 %v3829_v28, %v3829_v28  ;;  %769 = vmatpush1.bf16.msra.mxu0 %v3322_v37 }
 0x113   : > { %770 = vmatprep.subr.bf16.mxu0 %v3323_v15 }
 0x114   : > { %463 = vadd.xlane.f32.xlu1 %v434_v12  ;;  %465 = vadd.xlane.f32.xlu0 %v435_v34 }
 0x116   : > { %771 = vmatpush1.bf16.msra.mxu0 %v3326_v39 }
 0x117   : > { %772 = vmatprep.subr.bf16.mxu0 %v3327_v42 }
 0x118   : > { %467 = vadd.xlane.f32.xlu1 %v436_v35 }
 0x11a   : > { %773 = vmatpush1.bf16.msra.mxu0 %v3330_v44 }
 0x185   : > { %v438_v47 = vpop.xlane.xlu0 %437 }
 0x186   : > { %v469_v50 = vmul.f32 0.0078125, %v438_v47 }
 0x188   : > { %v485_v51 = vadd.f32 1e-06, %v469_v50 }
 0x189   : > { %v440_v52 = vpop.xlane.xlu1 %439  ;;  %v442_v53 = vpop.xlane.xlu0 %441 }
 0x18a   : > { %3332 = vrsqrt.f32 %v485_v51  ;;  %v470_v54 = vmul.f32 0.0078125, %v440_v52  ;;  %v471_v55 = vmul.f32 0.0078125, %v442_v53 }
 0x18c   : > { %v486_v58 = vadd.f32 1e-06, %v470_v54  ;;  %v487_v59 = vadd.f32 1e-06, %v471_v55 }
 0x18d   : > { %v444_v60 = vpop.xlane.xlu1 %443  ;;  %v446_v61 = vpop.xlane.xlu0 %445 }
 0x18e   : > { %3334 = vrsqrt.f32 %v486_v58  ;;  %v472_v62 = vmul.f32 0.0078125, %v444_v60  ;;  %v473_v63 = vmul.f32 0.0078125, %v446_v61 }
 0x18f   : > { %3336 = vrsqrt.f32 %v487_v59 }
 0x190   : > { %v488_v0 = vadd.f32 1e-06, %v472_v62  ;;  %v489_v1 = vadd.f32 1e-06, %v473_v63 }
 0x191   : > { %v448_v2 = vpop.xlane.xlu1 %447  ;;  %v450_v5 = vpop.xlane.xlu0 %449 }
 0x192   : > { %3338 = vrsqrt.f32 %v488_v0  ;;  %v474_v6 = vmul.f32 0.0078125, %v448_v2  ;;  %v475_v7 = vmul.f32 0.0078125, %v450_v5 }
 0x193   : > { %3340 = vrsqrt.f32 %v489_v1 }
 0x194   : > { %v3333_v8 = vpop.eup %3332  ;;  %v490_v9 = vadd.f32 1e-06, %v474_v6  ;;  %v491_v16 = vadd.f32 1e-06, %v475_v7 }
 0x195   : > { %v452_v10 = vpop.xlane.xlu1 %451  ;;  %v454_v18 = vpop.xlane.xlu0 %453  ;;  %v517_v19 = vmul.f32 %v3333_v8, %v3761_v24  ;;  %v3846_v24 = vld [vmem:[%s333_s7] ss:$0 sm:$0xff] }
 0x196   : > { %3342 = vrsqrt.f32 %v490_v9  ;;  %v476_v20 = vmul.f32 0.0078125, %v452_v10  ;;  %v477_v21 = vmul.f32 0.0078125, %v454_v18 }
 0x197   : > { %3344 = vrsqrt.f32 %v491_v16  ;;  %v537_v34 = vmul.f32 %v3842_v22, %v517_v19 }
 0x198   : > { %v3335_v23 = vpop.eup %3334  ;;  %v492_v26 = vadd.f32 1e-06, %v476_v20  ;;  %v493_v27 = vadd.f32 1e-06, %v477_v21 }
 0x199   : > { %v3337_v12 = vpop.eup %3336  ;;  %v456_v29 = vpop.xlane.xlu1 %455  ;;  %v518_v31 = vmul.f32 %v3335_v23, %v3769_v32  ;;  %v557_v45 = vadd.f32 %v3846_v24, %v537_v34 }
 0x19a   : > { %v458_v30 = vpop.xlane.xlu0 %457  ;;  %3346 = vrsqrt.f32 %v492_v26  ;;  %v478_v35 = vmul.f32 0.0078125, %v456_v29  ;;  %v519_v36 = vmul.f32 %v3337_v12, %v3763_v25 }
 0x19b   : > { %v479_v14 = vmul.f32 0.0078125, %v458_v30  ;;  %3348 = vrsqrt.f32 %v493_v27  ;;  %v538_v37 = vmul.f32 %v3842_v22, %v518_v31 }
 0x19c   : > { %v3339_v15 = vpop.eup %3338  ;;  %v494_v38 = vadd.f32 1e-06, %v478_v35  ;;  %v539_v42 = vmul.f32 %v3842_v22, %v519_v36 }
 0x19d   : > { %v495_v39 = vadd.f32 1e-06, %v479_v14  ;;  %v3341_v43 = vpop.eup %3340  ;;  %v460_v44 = vpop.xlane.xlu1 %459  ;;  %v558_v47 = vadd.f32 %v3846_v24, %v538_v37  ;;  %v520_v50 = vmul.f32 %v3339_v15, %v3771_v33 }
 0x19e   : > { %v462_v32 = vpop.xlane.xlu0 %461  ;;  %3350 = vrsqrt.f32 %v494_v38  ;;  %v480_v51 = vmul.f32 0.0078125, %v460_v44  ;;  %v521_v54 = vmul.f32 %v3341_v43, %v3777_v40  ;;  %v559_v60 = vadd.f32 %v3846_v24, %v539_v42 }
 0x19f   : > { %v481_v25 = vmul.f32 0.0078125, %v462_v32  ;;  %3352 = vrsqrt.f32 %v495_v39  ;;  %v573_v52 = vpack.c.bf16 %v558_v47, %v557_v45  ;;  %v540_v53 = vmul.f32 %v3842_v22, %v520_v50 }
 0x1a0   : > { %v3343_v55 = vpop.eup %3342  ;;  %v496_v58 = vadd.f32 1e-06, %v480_v51  ;;  %v541_v1 = vmul.f32 %v3842_v22, %v521_v54 }
 0x1a1   : > { %v497_v59 = vadd.f32 1e-06, %v481_v25  ;;  %v3345_v61 = vpop.eup %3344  ;;  %v464_v62 = vpop.xlane.xlu1 %463  ;;  %791 = vmatmul.mubr.bf16.vlgmr.msra.gmra.mrb[0].mxu0 %v573_v52  ;;  %3194 = vmatprep.mubr.bf16.mxu1 %v573_v52  ;;  %v560_v33 = vadd.f32 %v3846_v24, %v540_v53  ;;  %v522_v0 = vmul.f32 %v3343_v55, %v3779_v41 }
 0x1a2   : > { %v466_v63 = vpop.xlane.xlu0 %465  ;;  %3354 = vrsqrt.f32 %v496_v58  ;;  %v482_v2 = vmul.f32 0.0078125, %v464_v62  ;;  %800 = vmatprep.mubr.bf16.mxu0 %v3500_v46  ;;  %v523_v40 = vmul.f32 %v3345_v61, %v3786_v48  ;;  %v561_v19 = vadd.f32 %v3846_v24, %v541_v1 }
 0x1a3   : > { %v483_v5 = vmul.f32 0.0078125, %v466_v63  ;;  %3356 = vrsqrt.f32 %v497_v59  ;;  %v574_v6 = vpack.c.bf16 %v560_v33, %v559_v60  ;;  %v542_v7 = vmul.f32 %v3842_v22, %v522_v0 }
 0x1a4   : > { %v3347_v8 = vpop.eup %3346  ;;  %v498_v9 = vadd.f32 1e-06, %v482_v2  ;;  %v543_v10 = vmul.f32 %v3842_v22, %v523_v40 }
 0x1a5   : > { %v499_v16 = vadd.f32 1e-06, %v483_v5  ;;  %v3349_v18 = vpop.eup %3348  ;;  %v468_v41 = vpop.xlane.xlu1 %467  ;;  %3195 = vmatmul.mubr.bf16.vlgmr.msra.gmra.mrb[0].mxu1 %v574_v6  ;;  %v562_v20 = vadd.f32 %v3846_v24, %v542_v7  ;;  %v524_v21 = vmul.f32 %v3347_v8, %v3789_v49 }
 0x1a6   : > { %3358 = vrsqrt.f32 %v498_v9  ;;  %v484_v48 = vmul.f32 0.0078125, %v468_v41  ;;  %v525_v23 = vmul.f32 %v3349_v18, %v3796_v56  ;;  %v563_v30 = vadd.f32 %v3846_v24, %v543_v10 }
 0x1a7   : > { %3360 = vrsqrt.f32 %v499_v16  ;;  %v575_v26 = vpack.c.bf16 %v562_v20, %v561_v19  ;;  %v544_v27 = vmul.f32 %v3842_v22, %v524_v21 }
 0x1a8   : > { %v3351_v12 = vpop.eup %3350  ;;  %v500_v29 = vadd.f32 1e-06, %v484_v48  ;;  %v545_v49 = vmul.f32 %v3842_v22, %v525_v23 }
 0x1a9   : > { %v3353_v31 = vpop.eup %3352  ;;  %801 = vmatmul.mubr.bf16.gmra.mrb[4].mxu0 %v574_v6  ;;  %3198 = vmatprep.mubr.bf16.mxu1 %v575_v26  ;;  %v564_v34 = vadd.f32 %v3846_v24, %v544_v27  ;;  %v526_v35 = vmul.f32 %v3351_v12, %v3799_v57 }
 0x1aa   : > { %3362 = vrsqrt.f32 %v500_v29  ;;  %810 = vmatprep.mubr.bf16.mxu0 %v3500_v46  ;;  %v527_v56 = vmul.f32 %v3353_v31, %v3806_v3  ;;  %v565_v39 = vadd.f32 %v3846_v24, %v545_v49 }
 0x1ab   : > { %v576_v14 = vpack.c.bf16 %v564_v34, %v563_v30  ;;  %v546_v36 = vmul.f32 %v3842_v22, %v526_v35 }
 0x1ac   : > { %v3355_v37 = vpop.eup %3354  ;;  %v547_v15 = vmul.f32 %v3842_v22, %v527_v56 }
 0x1ad   : > { %v3357_v38 = vpop.eup %3356  ;;  %3199 = vmatmul.mubr.bf16.gmra.mrb[4].mxu1 %v576_v14  ;;  %v566_v42 = vadd.f32 %v3846_v24, %v546_v36  ;;  %v528_v57 = vmul.f32 %v3355_v37, %v3809_v4 }
 0x1ae   : > { %v529_v43 = vmul.f32 %v3357_v38, %v3816_v11  ;;  %v567_v45 = vadd.f32 %v3846_v24, %v547_v15 }
 0x1af   : > { %v577_v44 = vpack.c.bf16 %v566_v42, %v565_v39  ;;  %v548_v32 = vmul.f32 %v3842_v22, %v528_v57 }
 0x1b0   : > { %v3359_v3 = vpop.eup %3358  ;;  %v549_v25 = vmul.f32 %v3842_v22, %v529_v43 }
 0x1b1   : > { %v3361_v47 = vpop.eup %3360  ;;  %811 = vmatmul.mubr.bf16.gmra.mrb[8].mxu0 %v575_v26  ;;  %3202 = vmatprep.mubr.bf16.mxu1 %v577_v44  ;;  %v568_v50 = vadd.f32 %v3846_v24, %v548_v32  ;;  %v530_v51 = vmul.f32 %v3359_v3, %v3819_v17 }
 0x1b2   : > { %820 = vmatprep.mubr.bf16.mxu0 %v3500_v46  ;;  %v531_v4 = vmul.f32 %v3361_v47, %v3826_v13  ;;  %v569_v54 = vadd.f32 %v3846_v24, %v549_v25 }
 0x1b3   : > { %v578_v11 = vpack.c.bf16 %v568_v50, %v567_v45  ;;  %v550_v52 = vmul.f32 %v3842_v22, %v530_v51 }
 0x1b4   : > { %v3363_v53 = vpop.eup %3362  ;;  %v551_v59 = vmul.f32 %v3842_v22, %v531_v4 }
 0x1b5   : > { %3203 = vmatmul.mubr.bf16.gmra.mrb[8].mxu1 %v578_v11  ;;  %v570_v55 = vadd.f32 %v3846_v24, %v550_v52  ;;  %v532_v58 = vmul.f32 %v3363_v53, %v3829_v28  ;;  %v615_v28 = vlaneseq }
 0x1b6   : > { %v571_v13 = vadd.f32 %v3846_v24, %v551_v59 }
 0x1b7   : > { %v579_v17 = vpack.c.bf16 %v570_v55, %v569_v54  ;;  %v552_v60 = vmul.f32 %v3842_v22, %v532_v58  ;;  %v616_v22 = vshrl.u32 %v615_v28, 7 }
 0x1b9   : > { %821 = vmatmul.mubr.bf16.gmra.mrb[12].mxu0 %v576_v14  ;;  %3206 = vmatprep.mubr.bf16.mxu1 %v579_v17  ;;  %v572_v61 = vadd.f32 %v3846_v24, %v552_v60  ;;  %v617_v63 = vsub.s32 0, %v616_v22  ;;  %v613_v24 = vld [vmem:[%s5019_s3] sm:$0x7]  ;;  %v621_v33 = vsub.s32 1, %v616_v22  ;;  %v625_v1 = vsub.s32 2, %v616_v22 }
 0x1ba   : > { %830 = vmatprep.mubr.bf16.mxu0 %v3500_v46 }
 0x1bb   : > { %v580_v62 = vpack.c.bf16 %v572_v61, %v571_v13  ;;  %v3903_v0 = vrot.slane %v613_v24, %v617_v63  ;;  %v3905_v2 = vrot.slane %v613_v24, %v621_v33  ;;  %v3911_v6 = vrot.slane %v613_v24, %v625_v1 }
 0x1bd   : > { %3207 = vmatmul.mubr.bf16.gmra.mrb[12].mxu1 %v580_v62 }
 0x1c1   : > { %831 = vmatmul.mubr.bf16.gmra.mrb[16].mxu0 %v577_v44 }
 0x1c2   : > { %840 = vmatprep.mubr.bf16.mxu0 %v3500_v46 }
 0x1c9   : > { %841 = vmatmul.mubr.bf16.gmra.mrb[20].mxu0 %v578_v11 }
 0x1ca   : > { %850 = vmatprep.mubr.bf16.mxu0 %v3500_v46 }
 0x1d1   : > { %851 = vmatmul.mubr.bf16.gmra.mrb[24].mxu0 %v579_v17 }
 0x1d2   : > { %860 = vmatprep.mubr.bf16.mxu0 %v3500_v46 }
 0x1d9   : > { %861 = vmatmul.mubr.bf16.gmra.mrb[28].mxu0 %v580_v62 }
 0x274   : > { %v792_v5 = vpop.f32.mrb[0].mxu0 }
 0x275   : > { %v793_v46 = vadd.f32 %v792_v5, %v3903_v0  ;;  %v794_v40 = vpop.f32.mrb[1].mxu0 }
 0x276   : > { %v795_v7 = vadd.f32 %v794_v40, %v3905_v2  ;;  %v796_v8 = vpop.f32.mrb[2].mxu0 }
 0x277   : > { %v3114_v9 = vpack.c.bf16 %v793_v46, %v793_v46  ;;  %v797_v16 = vadd.f32 %v796_v8, %v3903_v0  ;;  %v798_v10 = vpop.f32.mrb[3].mxu0 }
 0x278   : > { %v3915_v18 = vpack.c.bf16 %v795_v7, %v795_v7  ;;  %v799_v41 = vadd.f32 %v798_v10, %v3905_v2  ;;  %v3196_v19 = vpop.f32.mrb[0].mxu1 }
 0x279   : > { %1049 = vst.msk [vmem:[%s3919_s19] sm:$0xf] %vm1048_vm0, %v3114_v9  ;;  %v3115_v20 = vpack.c.bf16 %v797_v16, %v797_v16  ;;  %v914_v21 = vadd.f32 %v3196_v19, %v3911_v6  ;;  %1065 = vrot.lane.b32.xlu0 %v3114_v9, %s3501_s18  ;;  %v905_v48 = vpop.f32.mrb[1].mxu1 }
 0x27a   : > { %1316 = vst.msk [vmem:[%s3926_s20] sm:$0xf] %vm1048_vm0, %v3915_v18  ;;  %v3931_v23 = vpack.c.bf16 %v799_v41, %v799_v41  ;;  %v906_v26 = vadd.f32 %v905_v48, %v3911_v6  ;;  %v3197_v27 = vpop.f32.mrb[2].mxu1 }
 0x27b   : > { %1050 = vst.msk [vmem:[%s3919_s19 + $0x4] sm:$0xf] %vm1048_vm0, %v3115_v20  ;;  %v3936_v12 = vpack.c.bf16 %v914_v21, %v914_v21  ;;  %v917_v29 = vadd.f32 %v3197_v27, %v3911_v6  ;;  %1067 = vrot.lane.b32.xlu1 %v3115_v20, %s3501_s18  ;;  %v908_v30 = vpop.f32.mrb[3].mxu1 }
 0x27c   : > { %1317 = vst.msk [vmem:[%s3926_s20 + $0x4] sm:$0xf] %vm1048_vm0, %v3931_v23  ;;  %v3943_v31 = vpack.c.bf16 %v906_v26, %v906_v26  ;;  %v909_v34 = vadd.f32 %v908_v30, %v3911_v6  ;;  %v802_v35 = vpop.f32.mrb[4].mxu0 }
 0x27d   : > { %1585 = vst.msk [vmem:[%s3947_s21 + $0x8] sm:$0xf] %vm1048_vm0, %v3936_v12  ;;  %v3952_v49 = vpack.c.bf16 %v917_v29, %v917_v29  ;;  %v803_v56 = vadd.f32 %v802_v35, %v3903_v0  ;;  %1130 = vrot.lane.b32.xlu0 %v3114_v9, %s3502_s29  ;;  %v804_v14 = vpop.f32.mrb[5].mxu0 }
 0x27e   : > { %1583 = vst.msk [vmem:[%s3947_s21] sm:$0xf] %vm1048_vm0, %v3943_v31  ;;  %v3959_v36 = vpack.c.bf16 %v909_v34, %v909_v34  ;;  %v805_v37 = vadd.f32 %v804_v14, %v3905_v2  ;;  %v806_v15 = vpop.f32.mrb[6].mxu0 }
 0x27f   : > { %1586 = vst.msk [vmem:[%s3947_s21 + $0xc] sm:$0xf] %vm1048_vm0, %v3952_v49  ;;  %v3965_v38 = vpack.c.bf16 %v803_v56, %v803_v56  ;;  %v807_v39 = vadd.f32 %v806_v15, %v3903_v0  ;;  %1132 = vrot.lane.b32.xlu1 %v3115_v20, %s3502_s29  ;;  %v808_v42 = vpop.f32.mrb[7].mxu0 }
 0x280   : > { %1584 = vst.msk [vmem:[%s3947_s21 + $0x4] sm:$0xf] %vm1048_vm0, %v3959_v36  ;;  %v3972_v57 = vpack.c.bf16 %v805_v37, %v805_v37  ;;  %v809_v43 = vadd.f32 %v808_v42, %v3905_v2  ;;  %v3200_v44 = vpop.f32.mrb[4].mxu1 }
 0x281   : > { %1051 = vst.msk [vmem:[%s3919_s19 + $0x8] sm:$0xf] %vm1048_vm0, %v3965_v38  ;;  %v3978_v32 = vpack.c.bf16 %v807_v39, %v807_v39  ;;  %v930_v3 = vadd.f32 %v3200_v44, %v3911_v6  ;;  %1195 = vrot.lane.b32.xlu0 %v3114_v9, %s3503_s10  ;;  %v921_v45 = vpop.f32.mrb[5].mxu1 }
 0x282   : > { %1318 = vst.msk [vmem:[%s3926_s20 + $0x8] sm:$0xf] %vm1048_vm0, %v3972_v57  ;;  %v3985_v47 = vpack.c.bf16 %v809_v43, %v809_v43  ;;  %v922_v50 = vadd.f32 %v921_v45, %v3911_v6  ;;  %v3201_v51 = vpop.f32.mrb[6].mxu1 }
 0x283   : > { %1052 = vst.msk [vmem:[%s3919_s19 + $0xc] sm:$0xf] %vm1048_vm0, %v3978_v32  ;;  %v3991_v25 = vpack.c.bf16 %v930_v3, %v930_v3  ;;  %v933_v4 = vadd.f32 %v3201_v51, %v3911_v6  ;;  %1197 = vrot.lane.b32.xlu1 %v3115_v20, %s3503_s10  ;;  %v924_v11 = vpop.f32.mrb[7].mxu1 }
 0x284   : > { %1319 = vst.msk [vmem:[%s3926_s20 + $0xc] sm:$0xf] %vm1048_vm0, %v3985_v47  ;;  %v3998_v52 = vpack.c.bf16 %v922_v50, %v922_v50  ;;  %v925_v53 = vadd.f32 %v924_v11, %v3911_v6  ;;  %v812_v54 = vpop.f32.mrb[8].mxu0 }
 0x285   : > { %1589 = vst.msk [vmem:[%s3947_s21 + $0x18] sm:$0xf] %vm1048_vm0, %v3991_v25  ;;  %v4004_v55 = vpack.c.bf16 %v933_v4, %v933_v4  ;;  %v813_v58 = vadd.f32 %v812_v54, %v3903_v0  ;;  %1332 = vrot.lane.b32.xlu0 %v3915_v18, %s3501_s18  ;;  %v814_v59 = vpop.f32.mrb[9].mxu0 }
 0x286   : > { %1587 = vst.msk [vmem:[%s3947_s21 + $0x10] sm:$0xf] %vm1048_vm0, %v3998_v52  ;;  %v4012_v17 = vpack.c.bf16 %v925_v53, %v925_v53  ;;  %v815_v60 = vadd.f32 %v814_v59, %v3905_v2  ;;  %v816_v13 = vpop.f32.mrb[10].mxu0 }
 0x287   : > { %1590 = vst.msk [vmem:[%s3947_s21 + $0x1c] sm:$0xf] %vm1048_vm0, %v4004_v55  ;;  %v4018_v61 = vpack.c.bf16 %v813_v58, %v813_v58  ;;  %v817_v62 = vadd.f32 %v816_v13, %v3903_v0  ;;  %1334 = vrot.lane.b32.xlu1 %v3931_v23, %s3501_s18  ;;  %v818_v28 = vpop.f32.mrb[11].mxu0 }
 0x288   : > { %1588 = vst.msk [vmem:[%s3947_s21 + $0x14] sm:$0xf] %vm1048_vm0, %v4012_v17  ;;  %v4026_v22 = vpack.c.bf16 %v815_v60, %v815_v60  ;;  %v819_v63 = vadd.f32 %v818_v28, %v3905_v2  ;;  %v3204_v24 = vpop.f32.mrb[8].mxu1 }
 0x289   : > { %1053 = vst.msk [vmem:[%s3919_s19 + $0x10] sm:$0xf] %vm1048_vm0, %v4018_v61  ;;  %v4032_v33 = vpack.c.bf16 %v817_v62, %v817_v62  ;;  %v946_v1 = vadd.f32 %v3204_v24, %v3911_v6  ;;  %1397 = vrot.lane.b32.xlu0 %v3915_v18, %s3502_s29  ;;  %v937_v5 = vpop.f32.mrb[9].mxu1 }
 0x28a   : > { %1320 = vst.msk [vmem:[%s3926_s20 + $0x10] sm:$0xf] %vm1048_vm0, %v4026_v22  ;;  %v4040_v46 = vpack.c.bf16 %v819_v63, %v819_v63  ;;  %v938_v40 = vadd.f32 %v937_v5, %v3911_v6  ;;  %v3205_v7 = vpop.f32.mrb[10].mxu1 }
 0x28b   : > { %1054 = vst.msk [vmem:[%s3919_s19 + $0x14] sm:$0xf] %vm1048_vm0, %v4032_v33  ;;  %v4046_v8 = vpack.c.bf16 %v946_v1, %v946_v1  ;;  %v949_v9 = vadd.f32 %v3205_v7, %v3911_v6  ;;  %1399 = vrot.lane.b32.xlu1 %v3931_v23, %s3502_s29  ;;  %v940_v16 = vpop.f32.mrb[11].mxu1 }
 0x28c   : > { %1321 = vst.msk [vmem:[%s3926_s20 + $0x14] sm:$0xf] %vm1048_vm0, %v4040_v46  ;;  %v4054_v10 = vpack.c.bf16 %v938_v40, %v938_v40  ;;  %v941_v41 = vadd.f32 %v940_v16, %v3911_v6  ;;  %v822_v19 = vpop.f32.mrb[12].mxu0 }
 0x28d   : > { %1593 = vst.msk [vmem:[%s3947_s21 + $0x28] sm:$0xf] %vm1048_vm0, %v4046_v8  ;;  %v4060_v20 = vpack.c.bf16 %v949_v9, %v949_v9  ;;  %v823_v21 = vadd.f32 %v822_v19, %v3903_v0  ;;  %1462 = vrot.lane.b32.xlu0 %v3915_v18, %s3503_s10  ;;  %v824_v48 = vpop.f32.mrb[13].mxu0 }
 0x28e   : > { %1591 = vst.msk [vmem:[%s3947_s21 + $0x20] sm:$0xf] %vm1048_vm0, %v4054_v10  ;;  %v4068_v26 = vpack.c.bf16 %v941_v41, %v941_v41  ;;  %v825_v27 = vadd.f32 %v824_v48, %v3905_v2  ;;  %v826_v29 = vpop.f32.mrb[14].mxu0 }
 0x28f   : > { %1594 = vst.msk [vmem:[%s3947_s21 + $0x2c] sm:$0xf] %vm1048_vm0, %v4060_v20  ;;  %v4074_v30 = vpack.c.bf16 %v823_v21, %v823_v21  ;;  %v827_v34 = vadd.f32 %v826_v29, %v3903_v0  ;;  %1464 = vrot.lane.b32.xlu1 %v3931_v23, %s3503_s10  ;;  %v828_v18 = vpop.f32.mrb[15].mxu0 }
 0x290   : > { %1592 = vst.msk [vmem:[%s3947_s21 + $0x24] sm:$0xf] %vm1048_vm0, %v4068_v26  ;;  %v4082_v35 = vpack.c.bf16 %v825_v27, %v825_v27  ;;  %v829_v56 = vadd.f32 %v828_v18, %v3905_v2  ;;  %v3208_v14 = vpop.f32.mrb[12].mxu1 }
 0x291   : > { %1055 = vst.msk [vmem:[%s3919_s19 + $0x18] sm:$0xf] %vm1048_vm0, %v4074_v30  ;;  %v4088_v37 = vpack.c.bf16 %v827_v34, %v827_v34  ;;  %v962_v15 = vadd.f32 %v3208_v14, %v3911_v6  ;;  %1603 = vrot.lane.b32.xlu0 %v3936_v12, %s3501_s18  ;;  %v953_v23 = vpop.f32.mrb[13].mxu1 }
 0x292   : > { %1322 = vst.msk [vmem:[%s3926_s20 + $0x18] sm:$0xf] %vm1048_vm0, %v4082_v35  ;;  %v4096_v39 = vpack.c.bf16 %v829_v56, %v829_v56  ;;  %v954_v42 = vadd.f32 %v953_v23, %v3911_v6  ;;  %v3209_v43 = vpop.f32.mrb[14].mxu1 }
 0x293   : > { %1056 = vst.msk [vmem:[%s3919_s19 + $0x1c] sm:$0xf] %vm1048_vm0, %v4088_v37  ;;  %v4102_v44 = vpack.c.bf16 %v962_v15, %v962_v15  ;;  %v965_v3 = vadd.f32 %v3209_v43, %v3911_v6  ;;  %1605 = vrot.lane.b32.xlu1 %v3952_v49, %s3501_s18  ;;  %v956_v45 = vpop.f32.mrb[15].mxu1 }
 0x294   : > { %1323 = vst.msk [vmem:[%s3926_s20 + $0x1c] sm:$0xf] %vm1048_vm0, %v4096_v39  ;;  %v4110_v50 = vpack.c.bf16 %v954_v42, %v954_v42  ;;  %v957_v51 = vadd.f32 %v956_v45, %v3911_v6  ;;  %v832_v4 = vpop.f32.mrb[16].mxu0 }
 0x295   : > { %1597 = vst.msk [vmem:[%s3947_s21 + $0x38] sm:$0xf] %vm1048_vm0, %v4102_v44  ;;  %v4116_v11 = vpack.c.bf16 %v965_v3, %v965_v3  ;;  %v833_v53 = vadd.f32 %v832_v4, %v3903_v0  ;;  %1668 = vrot.lane.b32.xlu0 %v3936_v12, %s3502_s29  ;;  %v834_v54 = vpop.f32.mrb[17].mxu0 }
 0x296   : > { %1595 = vst.msk [vmem:[%s3947_s21 + $0x30] sm:$0xf] %vm1048_vm0, %v4110_v50  ;;  %v4124_v58 = vpack.c.bf16 %v957_v51, %v957_v51  ;;  %v835_v6 = vadd.f32 %v834_v54, %v3905_v2  ;;  %v836_v59 = vpop.f32.mrb[18].mxu0 }
 0x297   : > { %1598 = vst.msk [vmem:[%s3947_s21 + $0x3c] sm:$0xf] %vm1048_vm0, %v4116_v11  ;;  %v4130_v60 = vpack.c.bf16 %v833_v53, %v833_v53  ;;  %v837_v13 = vadd.f32 %v836_v59, %v3903_v0  ;;  %1670 = vrot.lane.b32.xlu1 %v3952_v49, %s3502_s29  ;;  %v838_v62 = vpop.f32.mrb[19].mxu0 }
 0x298   : > { %1596 = vst.msk [vmem:[%s3947_s21 + $0x34] sm:$0xf] %vm1048_vm0, %v4124_v58  ;;  %v4138_v28 = vpack.c.bf16 %v835_v6, %v835_v6  ;;  %v839_v63 = vadd.f32 %v838_v62, %v3905_v2 }
 0x299   : > { %1057 = vst.msk [vmem:[%s3919_s19 + $0x20] sm:$0xf] %vm1048_vm0, %v4130_v60  ;;  %v4144_v24 = vpack.c.bf16 %v837_v13, %v837_v13  ;;  %1733 = vrot.lane.b32.xlu0 %v3936_v12, %s3503_s10 }
 0x29a   : > { %1324 = vst.msk [vmem:[%s3926_s20 + $0x20] sm:$0xf] %vm1048_vm0, %v4138_v28  ;;  %v4151_v1 = vpack.c.bf16 %v839_v63, %v839_v63 }
 0x29b   : > { %1058 = vst.msk [vmem:[%s3919_s19 + $0x24] sm:$0xf] %vm1048_vm0, %v4144_v24  ;;  %1735 = vrot.lane.b32.xlu1 %v3952_v49, %s3503_s10 }
 0x29c   : > { %1325 = vst.msk [vmem:[%s3926_s20 + $0x24] sm:$0xf] %vm1048_vm0, %v4151_v1  ;;  %v842_v5 = vpop.f32.mrb[20].mxu0 }
 0x29d   : > { %v843_v40 = vadd.f32 %v842_v5, %v3903_v0  ;;  %1599 = vrot.lane.b32.xlu0 %v3943_v31, %s3501_s18  ;;  %v844_v12 = vpop.f32.mrb[21].mxu0 }
 0x29e   : > { %v845_v7 = vadd.f32 %v844_v12, %v3905_v2  ;;  %v846_v9 = vpop.f32.mrb[22].mxu0 }
 0x29f   : > { %v4165_v16 = vpack.c.bf16 %v843_v40, %v843_v40  ;;  %v847_v49 = vadd.f32 %v846_v9, %v3903_v0  ;;  %1601 = vrot.lane.b32.xlu1 %v3959_v36, %s3501_s18  ;;  %v848_v41 = vpop.f32.mrb[23].mxu0 }
 0x2a0   : > { %v4170_v19 = vpack.c.bf16 %v845_v7, %v845_v7  ;;  %v849_v21 = vadd.f32 %v848_v41, %v3905_v2 }
 0x2a1   : > { %1059 = vst.msk [vmem:[%s3919_s19 + $0x28] sm:$0xf] %vm1048_vm0, %v4165_v16  ;;  %v4176_v48 = vpack.c.bf16 %v847_v49, %v847_v49  ;;  %1664 = vrot.lane.b32.xlu0 %v3943_v31, %s3502_s29 }
 0x2a2   : > { %1326 = vst.msk [vmem:[%s3926_s20 + $0x28] sm:$0xf] %vm1048_vm0, %v4170_v19  ;;  %v4183_v27 = vpack.c.bf16 %v849_v21, %v849_v21 }
 0x2a3   : > { %1060 = vst.msk [vmem:[%s3919_s19 + $0x2c] sm:$0xf] %vm1048_vm0, %v4176_v48  ;;  %1666 = vrot.lane.b32.xlu1 %v3959_v36, %s3502_s29 }
 0x2a4   : > { %1327 = vst.msk [vmem:[%s3926_s20 + $0x2c] sm:$0xf] %vm1048_vm0, %v4183_v27  ;;  %v852_v29 = vpop.f32.mrb[24].mxu0 }
 0x2a5   : > { %v853_v34 = vadd.f32 %v852_v29, %v3903_v0  ;;  %1729 = vrot.lane.b32.xlu0 %v3943_v31, %s3503_s10  ;;  %v854_v18 = vpop.f32.mrb[25].mxu0 }
 0x2a6   : > { %v855_v56 = vadd.f32 %v854_v18, %v3905_v2  ;;  %v856_v14 = vpop.f32.mrb[26].mxu0 }
 0x2a7   : > { %v4197_v15 = vpack.c.bf16 %v853_v34, %v853_v34  ;;  %v857_v23 = vadd.f32 %v856_v14, %v3903_v0  ;;  %1731 = vrot.lane.b32.xlu1 %v3959_v36, %s3503_s10  ;;  %v858_v42 = vpop.f32.mrb[27].mxu0 }
 0x2a8   : > { %v4202_v43 = vpack.c.bf16 %v855_v56, %v855_v56  ;;  %v859_v3 = vadd.f32 %v858_v42, %v3905_v2 }
 0x2a9   : > { %1061 = vst.msk [vmem:[%s3919_s19 + $0x30] sm:$0xf] %vm1048_vm0, %v4197_v15  ;;  %v4208_v31 = vpack.c.bf16 %v857_v23, %v857_v23  ;;  %1134 = vrot.lane.b32.xlu0 %v3965_v38, %s3502_s29 }
 0x2aa   : > { %1328 = vst.msk [vmem:[%s3926_s20 + $0x30] sm:$0xf] %vm1048_vm0, %v4202_v43  ;;  %v4215_v45 = vpack.c.bf16 %v859_v3, %v859_v3 }
 0x2ab   : > { %1062 = vst.msk [vmem:[%s3919_s19 + $0x34] sm:$0xf] %vm1048_vm0, %v4208_v31  ;;  %1069 = vrot.lane.b32.xlu1 %v3965_v38, %s3501_s18 }
 0x2ac   : > { %1329 = vst.msk [vmem:[%s3926_s20 + $0x34] sm:$0xf] %vm1048_vm0, %v4215_v45  ;;  %v862_v36 = vpop.f32.mrb[28].mxu0 }
 0x2ad   : > { %v863_v51 = vadd.f32 %v862_v36, %v3903_v0  ;;  %1199 = vrot.lane.b32.xlu0 %v3965_v38, %s3503_s10  ;;  %v864_v4 = vpop.f32.mrb[29].mxu0 }
 0x2ae   : > { %v865_v53 = vadd.f32 %v864_v4, %v3905_v2  ;;  %v866_v54 = vpop.f32.mrb[30].mxu0 }
 0x2af   : > { %v4229_v6 = vpack.c.bf16 %v863_v51, %v863_v51  ;;  %v867_v59 = vadd.f32 %v866_v54, %v3903_v0  ;;  %1071 = vrot.lane.b32.xlu1 %v3978_v32, %s3501_s18  ;;  %v868_v13 = vpop.f32.mrb[31].mxu0 }
 0x2b0   : > { %v4234_v62 = vpack.c.bf16 %v865_v53, %v865_v53  ;;  %v869_v63 = vadd.f32 %v868_v13, %v3905_v2 }
 0x2b1   : > { %1063 = vst.msk [vmem:[%s3919_s19 + $0x38] sm:$0xf] %vm1048_vm0, %v4229_v6  ;;  %v4240_v38 = vpack.c.bf16 %v867_v59, %v867_v59  ;;  %1336 = vrot.lane.b32.xlu0 %v3972_v57, %s3501_s18 }
 0x2b2   : > { %1330 = vst.msk [vmem:[%s3926_s20 + $0x38] sm:$0xf] %vm1048_vm0, %v4234_v62  ;;  %v4247_v0 = vpack.c.bf16 %v869_v63, %v869_v63 }
 0x2b3   : > { %1064 = vst.msk [vmem:[%s3919_s19 + $0x3c] sm:$0xf] %vm1048_vm0, %v4240_v38  ;;  %1136 = vrot.lane.b32.xlu1 %v3978_v32, %s3502_s29 }
 0x2b4   : > { %1331 = vst.msk [vmem:[%s3926_s20 + $0x3c] sm:$0xf] %vm1048_vm0, %v4247_v0 }
 0x2b5   : > { %1401 = vrot.lane.b32.xlu0 %v3972_v57, %s3502_s29 }
 0x2b7   : > { %1201 = vrot.lane.b32.xlu1 %v3978_v32, %s3503_s10 }
 0x2b9   : > { %1466 = vrot.lane.b32.xlu0 %v3972_v57, %s3503_s10 }
 0x2bb   : > { %1338 = vrot.lane.b32.xlu1 %v3985_v47, %s3501_s18 }
 0x2bd   : > { %1611 = vrot.lane.b32.xlu0 %v3991_v25, %s3501_s18 }
 0x2bf   : > { %1403 = vrot.lane.b32.xlu1 %v3985_v47, %s3502_s29 }
 0x2c1   : > { %1676 = vrot.lane.b32.xlu0 %v3991_v25, %s3502_s29 }
 0x2c3   : > { %1468 = vrot.lane.b32.xlu1 %v3985_v47, %s3503_s10 }
 0x2c5   : > { %1741 = vrot.lane.b32.xlu0 %v3991_v25, %s3503_s10 }
 0x2c7   : > { %1613 = vrot.lane.b32.xlu1 %v4004_v55, %s3501_s18 }
 0x2c9   : > { %1607 = vrot.lane.b32.xlu0 %v3998_v52, %s3501_s18 }
 0x2cb   : > { %1678 = vrot.lane.b32.xlu1 %v4004_v55, %s3502_s29 }
 0x2cd   : > { %1672 = vrot.lane.b32.xlu0 %v3998_v52, %s3502_s29 }
 0x2cf   : > { %1743 = vrot.lane.b32.xlu1 %v4004_v55, %s3503_s10 }
 0x2d1   : > { %1737 = vrot.lane.b32.xlu0 %v3998_v52, %s3503_s10 }
 0x2d3   : > { %1609 = vrot.lane.b32.xlu1 %v4012_v17, %s3501_s18 }
 0x2d5   : > { %1073 = vrot.lane.b32.xlu0 %v4018_v61, %s3501_s18 }
 0x2d7   : > { %1674 = vrot.lane.b32.xlu1 %v4012_v17, %s3502_s29 }
 0x2d9   : > { %1138 = vrot.lane.b32.xlu0 %v4018_v61, %s3502_s29 }
 0x2db   : > { %1739 = vrot.lane.b32.xlu1 %v4012_v17, %s3503_s10 }
 0x2dd   : > { %1203 = vrot.lane.b32.xlu0 %v4018_v61, %s3503_s10 }
 0x2df   : > { %1075 = vrot.lane.b32.xlu1 %v4032_v33, %s3501_s18 }
 0x2e1   : > { %1340 = vrot.lane.b32.xlu0 %v4026_v22, %s3501_s18 }
 0x2e3   : > { %1140 = vrot.lane.b32.xlu1 %v4032_v33, %s3502_s29 }
 0x2e5   : > { %1405 = vrot.lane.b32.xlu0 %v4026_v22, %s3502_s29 }
 0x2e7   : > { %1205 = vrot.lane.b32.xlu1 %v4032_v33, %s3503_s10 }
 0x2e9   : > { %1470 = vrot.lane.b32.xlu0 %v4026_v22, %s3503_s10 }
 0x2eb   : > { %1342 = vrot.lane.b32.xlu1 %v4040_v46, %s3501_s18  ;;  %v1066_v2 = vpop.permute.xlu0 %1065 }
 0x2ec   : > { %2924 = vst.msk [vmem:[%s3919_s19 + $0x40] sm:$0xf] %vm1048_vm0, %v1066_v2 }
 0x2ed   : > { %v1068_v57 = vpop.permute.xlu1 %1067  ;;  %1619 = vrot.lane.b32.xlu0 %v4046_v8, %s3501_s18 }
 0x2ee   : > { %2925 = vst.msk [vmem:[%s3919_s19 + $0x44] sm:$0xf] %vm1048_vm0, %v1068_v57 }
 0x2ef   : > { %1407 = vrot.lane.b32.xlu1 %v4040_v46, %s3502_s29  ;;  %v1131_v32 = vpop.permute.xlu0 %1130 }
 0x2f0   : > { %2940 = vst.msk [vmem:[%s3919_s19 + $0x80] sm:$0xf] %vm1048_vm0, %v1131_v32 }
 0x2f1   : > { %v1133_v47 = vpop.permute.xlu1 %1132  ;;  %1684 = vrot.lane.b32.xlu0 %v4046_v8, %s3502_s29 }
 0x2f2   : > { %2941 = vst.msk [vmem:[%s3919_s19 + $0x84] sm:$0xf] %vm1048_vm0, %v1133_v47 }
 0x2f3   : > { %1472 = vrot.lane.b32.xlu1 %v4040_v46, %s3503_s10  ;;  %v1196_v25 = vpop.permute.xlu0 %1195 }
 0x2f4   : > { %2956 = vst.msk [vmem:[%s3919_s19 + $0xc0] sm:$0xf] %vm1048_vm0, %v1196_v25 }
 0x2f5   : > { %v1198_v52 = vpop.permute.xlu1 %1197  ;;  %1749 = vrot.lane.b32.xlu0 %v4046_v8, %s3503_s10 }
 0x2f6   : > { %2957 = vst.msk [vmem:[%s3919_s19 + $0xc4] sm:$0xf] %vm1048_vm0, %v1198_v52 }
 0x2f7   : > { %1621 = vrot.lane.b32.xlu1 %v4060_v20, %s3501_s18  ;;  %v1333_v55 = vpop.permute.xlu0 %1332 }
 0x2f8   : > { %2988 = vst.msk [vmem:[%s3926_s20 + $0x40] sm:$0xf] %vm1048_vm0, %v1333_v55 }
 0x2f9   : > { %v1335_v17 = vpop.permute.xlu1 %1334  ;;  %1615 = vrot.lane.b32.xlu0 %v4054_v10, %s3501_s18 }
 0x2fa   : > { %2989 = vst.msk [vmem:[%s3926_s20 + $0x44] sm:$0xf] %vm1048_vm0, %v1335_v17 }
 0x2fb   : > { %1686 = vrot.lane.b32.xlu1 %v4060_v20, %s3502_s29  ;;  %v1398_v61 = vpop.permute.xlu0 %1397 }
 0x2fc   : > { %3004 = vst.msk [vmem:[%s3926_s20 + $0x80] sm:$0xf] %vm1048_vm0, %v1398_v61 }
 0x2fd   : > { %v1400_v22 = vpop.permute.xlu1 %1399  ;;  %1680 = vrot.lane.b32.xlu0 %v4054_v10, %s3502_s29 }
 0x2fe   : > { %3005 = vst.msk [vmem:[%s3926_s20 + $0x84] sm:$0xf] %vm1048_vm0, %v1400_v22 }
 0x2ff   : > { %1751 = vrot.lane.b32.xlu1 %v4060_v20, %s3503_s10  ;;  %v1463_v33 = vpop.permute.xlu0 %1462 }
 0x300   : > { %3020 = vst.msk [vmem:[%s3926_s20 + $0xc0] sm:$0xf] %vm1048_vm0, %v1463_v33 }
 0x301   : > { %v1465_v46 = vpop.permute.xlu1 %1464  ;;  %1745 = vrot.lane.b32.xlu0 %v4054_v10, %s3503_s10 }
 0x302   : > { %3021 = vst.msk [vmem:[%s3926_s20 + $0xc4] sm:$0xf] %vm1048_vm0, %v1465_v46 }
 0x303   : > { %1617 = vrot.lane.b32.xlu1 %v4068_v26, %s3501_s18  ;;  %v1604_v8 = vpop.permute.xlu0 %1603 }
 0x304   : > { %3054 = vst.msk [vmem:[%s3947_s21 + $0x48] sm:$0xf] %vm1048_vm0, %v1604_v8 }
 0x305   : > { %v1606_v5 = vpop.permute.xlu1 %1605  ;;  %1077 = vrot.lane.b32.xlu0 %v4074_v30, %s3501_s18 }
 0x306   : > { %3055 = vst.msk [vmem:[%s3947_s21 + $0x4c] sm:$0xf] %vm1048_vm0, %v1606_v5 }
 0x307   : > { %1682 = vrot.lane.b32.xlu1 %v4068_v26, %s3502_s29  ;;  %v1669_v10 = vpop.permute.xlu0 %1668 }
 0x308   : > { %3070 = vst.msk [vmem:[%s3947_s21 + $0x88] sm:$0xf] %vm1048_vm0, %v1669_v10 }
 0x309   : > { %v1671_v20 = vpop.permute.xlu1 %1670  ;;  %1142 = vrot.lane.b32.xlu0 %v4074_v30, %s3502_s29 }
 0x30a   : > { %3071 = vst.msk [vmem:[%s3947_s21 + $0x8c] sm:$0xf] %vm1048_vm0, %v1671_v20 }
 0x30b   : > { %1747 = vrot.lane.b32.xlu1 %v4068_v26, %s3503_s10  ;;  %v1734_v40 = vpop.permute.xlu0 %1733 }
 0x30c   : > { %3086 = vst.msk [vmem:[%s3947_s21 + $0xc8] sm:$0xf] %vm1048_vm0, %v1734_v40 }
 0x30d   : > { %v1736_v12 = vpop.permute.xlu1 %1735  ;;  %1207 = vrot.lane.b32.xlu0 %v4074_v30, %s3503_s10 }
 0x30e   : > { %3087 = vst.msk [vmem:[%s3947_s21 + $0xcc] sm:$0xf] %vm1048_vm0, %v1736_v12 }
 0x30f   : > { %1079 = vrot.lane.b32.xlu1 %v4088_v37, %s3501_s18  ;;  %v1600_v7 = vpop.permute.xlu0 %1599 }
 0x310   : > { %3052 = vst.msk [vmem:[%s3947_s21 + $0x40] sm:$0xf] %vm1048_vm0, %v1600_v7 }
 0x311   : > { %v1602_v9 = vpop.permute.xlu1 %1601  ;;  %1344 = vrot.lane.b32.xlu0 %v4082_v35, %s3501_s18 }
 0x312   : > { %3053 = vst.msk [vmem:[%s3947_s21 + $0x44] sm:$0xf] %vm1048_vm0, %v1602_v9 }
 0x313   : > { %1144 = vrot.lane.b32.xlu1 %v4088_v37, %s3502_s29  ;;  %v1665_v26 = vpop.permute.xlu0 %1664 }
 0x314   : > { %3068 = vst.msk [vmem:[%s3947_s21 + $0x80] sm:$0xf] %vm1048_vm0, %v1665_v26 }
 0x315   : > { %v1667_v30 = vpop.permute.xlu1 %1666  ;;  %1409 = vrot.lane.b32.xlu0 %v4082_v35, %s3502_s29 }
 0x316   : > { %3069 = vst.msk [vmem:[%s3947_s21 + $0x84] sm:$0xf] %vm1048_vm0, %v1667_v30 }
 0x317   : > { %1209 = vrot.lane.b32.xlu1 %v4088_v37, %s3503_s10  ;;  %v1730_v49 = vpop.permute.xlu0 %1729 }
 0x318   : > { %3084 = vst.msk [vmem:[%s3947_s21 + $0xc0] sm:$0xf] %vm1048_vm0, %v1730_v49 }
 0x319   : > { %v1732_v41 = vpop.permute.xlu1 %1731  ;;  %1474 = vrot.lane.b32.xlu0 %v4082_v35, %s3503_s10 }
 0x31a   : > { %3085 = vst.msk [vmem:[%s3947_s21 + $0xc4] sm:$0xf] %vm1048_vm0, %v1732_v41 }
 0x31b   : > { %1346 = vrot.lane.b32.xlu1 %v4096_v39, %s3501_s18  ;;  %v1135_v21 = vpop.permute.xlu0 %1134 }
 0x31c   : > { %2942 = vst.msk [vmem:[%s3919_s19 + $0x88] sm:$0xf] %vm1048_vm0, %v1135_v21 }
 0x31d   : > { %v1070_v29 = vpop.permute.xlu1 %1069  ;;  %1627 = vrot.lane.b32.xlu0 %v4102_v44, %s3501_s18 }
 0x31e   : > { %2926 = vst.msk [vmem:[%s3919_s19 + $0x48] sm:$0xf] %vm1048_vm0, %v1070_v29 }
 0x31f   : > { %1411 = vrot.lane.b32.xlu1 %v4096_v39, %s3502_s29  ;;  %v1200_v35 = vpop.permute.xlu0 %1199 }
 0x320   : > { %2958 = vst.msk [vmem:[%s3919_s19 + $0xc8] sm:$0xf] %vm1048_vm0, %v1200_v35 }
 0x321   : > { %v1072_v37 = vpop.permute.xlu1 %1071  ;;  %1692 = vrot.lane.b32.xlu0 %v4102_v44, %s3502_s29 }
 0x322   : > { %2927 = vst.msk [vmem:[%s3919_s19 + $0x4c] sm:$0xf] %vm1048_vm0, %v1072_v37 }
 0x323   : > { %1476 = vrot.lane.b32.xlu1 %v4096_v39, %s3503_s10  ;;  %v1337_v34 = vpop.permute.xlu0 %1336 }
 0x324   : > { %2990 = vst.msk [vmem:[%s3926_s20 + $0x48] sm:$0xf] %vm1048_vm0, %v1337_v34 }
 0x325   : > { %v1137_v18 = vpop.permute.xlu1 %1136  ;;  %1623 = vrot.lane.b32.xlu0 %v4110_v50, %s3501_s18 }
 0x326   : > { %2943 = vst.msk [vmem:[%s3919_s19 + $0x8c] sm:$0xf] %vm1048_vm0, %v1137_v18 }
 0x327   : > { %1629 = vrot.lane.b32.xlu1 %v4116_v11, %s3501_s18  ;;  %v1402_v56 = vpop.permute.xlu0 %1401 }
 0x328   : > { %3006 = vst.msk [vmem:[%s3926_s20 + $0x88] sm:$0xf] %vm1048_vm0, %v1402_v56 }
 0x329   : > { %v1202_v14 = vpop.permute.xlu1 %1201  ;;  %1688 = vrot.lane.b32.xlu0 %v4110_v50, %s3502_s29 }
 0x32a   : > { %2959 = vst.msk [vmem:[%s3919_s19 + $0xcc] sm:$0xf] %vm1048_vm0, %v1202_v14 }
 0x32b   : > { %1694 = vrot.lane.b32.xlu1 %v4116_v11, %s3502_s29  ;;  %v1467_v39 = vpop.permute.xlu0 %1466 }
 0x32c   : > { %3022 = vst.msk [vmem:[%s3926_s20 + $0xc8] sm:$0xf] %vm1048_vm0, %v1467_v39 }
 0x32d   : > { %v1339_v23 = vpop.permute.xlu1 %1338  ;;  %1753 = vrot.lane.b32.xlu0 %v4110_v50, %s3503_s10 }
 0x32e   : > { %2991 = vst.msk [vmem:[%s3926_s20 + $0x4c] sm:$0xf] %vm1048_vm0, %v1339_v23 }
 0x32f   : > { %1625 = vrot.lane.b32.xlu1 %v4124_v58, %s3501_s18  ;;  %v1612_v42 = vpop.permute.xlu0 %1611 }
 0x330   : > { %3058 = vst.msk [vmem:[%s3947_s21 + $0x58] sm:$0xf] %vm1048_vm0, %v1612_v42 }
 0x331   : > { %v1404_v3 = vpop.permute.xlu1 %1403  ;;  %1081 = vrot.lane.b32.xlu0 %v4130_v60, %s3501_s18 }
 0x332   : > { %3007 = vst.msk [vmem:[%s3926_s20 + $0x8c] sm:$0xf] %vm1048_vm0, %v1404_v3 }
 0x333   : > { %1690 = vrot.lane.b32.xlu1 %v4124_v58, %s3502_s29  ;;  %v1677_v50 = vpop.permute.xlu0 %1676 }
 0x334   : > { %3074 = vst.msk [vmem:[%s3947_s21 + $0x98] sm:$0xf] %vm1048_vm0, %v1677_v50 }
 0x335   : > { %v1469_v36 = vpop.permute.xlu1 %1468  ;;  %1146 = vrot.lane.b32.xlu0 %v4130_v60, %s3502_s29 }
 0x336   : > { %3023 = vst.msk [vmem:[%s3926_s20 + $0xcc] sm:$0xf] %vm1048_vm0, %v1469_v36 }
 0x337   : > { %1755 = vrot.lane.b32.xlu1 %v4124_v58, %s3503_s10  ;;  %v1742_v51 = vpop.permute.xlu0 %1741 }
 0x338   : > { %3090 = vst.msk [vmem:[%s3947_s21 + $0xd8] sm:$0xf] %vm1048_vm0, %v1742_v51 }
 0x339   : > { %v1614_v4 = vpop.permute.xlu1 %1613  ;;  %1211 = vrot.lane.b32.xlu0 %v4130_v60, %s3503_s10 }
 0x33a   : > { %3059 = vst.msk [vmem:[%s3947_s21 + $0x5c] sm:$0xf] %vm1048_vm0, %v1614_v4 }
 0x33b   : > { %1083 = vrot.lane.b32.xlu1 %v4144_v24, %s3501_s18  ;;  %v1608_v53 = vpop.permute.xlu0 %1607 }
 0x33c   : > { %3056 = vst.msk [vmem:[%s3947_s21 + $0x50] sm:$0xf] %vm1048_vm0, %v1608_v53 }
 0x33d   : > { %v1679_v54 = vpop.permute.xlu1 %1678  ;;  %1348 = vrot.lane.b32.xlu0 %v4138_v28, %s3501_s18 }
 0x33e   : > { %3075 = vst.msk [vmem:[%s3947_s21 + $0x9c] sm:$0xf] %vm1048_vm0, %v1679_v54 }
 0x33f   : > { %1148 = vrot.lane.b32.xlu1 %v4144_v24, %s3502_s29  ;;  %v1673_v58 = vpop.permute.xlu0 %1672 }
 0x340   : > { %3072 = vst.msk [vmem:[%s3947_s21 + $0x90] sm:$0xf] %vm1048_vm0, %v1673_v58 }
 0x341   : > { %v1744_v60 = vpop.permute.xlu1 %1743  ;;  %1413 = vrot.lane.b32.xlu0 %v4138_v28, %s3502_s29 }
 0x342   : > { %3091 = vst.msk [vmem:[%s3947_s21 + $0xdc] sm:$0xf] %vm1048_vm0, %v1744_v60 }
 0x343   : > { %1213 = vrot.lane.b32.xlu1 %v4144_v24, %s3503_s10  ;;  %v1738_v59 = vpop.permute.xlu0 %1737 }
 0x344   : > { %3088 = vst.msk [vmem:[%s3947_s21 + $0xd0] sm:$0xf] %vm1048_vm0, %v1738_v59 }
 0x345   : > { %v1610_v13 = vpop.permute.xlu1 %1609  ;;  %1478 = vrot.lane.b32.xlu0 %v4138_v28, %s3503_s10 }
 0x346   : > { %3057 = vst.msk [vmem:[%s3947_s21 + $0x54] sm:$0xf] %vm1048_vm0, %v1610_v13 }
 0x347   : > { %1350 = vrot.lane.b32.xlu1 %v4151_v1, %s3501_s18  ;;  %v1074_v63 = vpop.permute.xlu0 %1073 }
 0x348   : > { %2928 = vst.msk [vmem:[%s3919_s19 + $0x50] sm:$0xf] %vm1048_vm0, %v1074_v63 }
 0x349   : > { %v1675_v2 = vpop.permute.xlu1 %1674  ;;  %1085 = vrot.lane.b32.xlu0 %v4165_v16, %s3501_s18 }
 0x34a   : > { %3073 = vst.msk [vmem:[%s3947_s21 + $0x94] sm:$0xf] %vm1048_vm0, %v1675_v2 }
 0x34b   : > { %1415 = vrot.lane.b32.xlu1 %v4151_v1, %s3502_s29  ;;  %v1139_v28 = vpop.permute.xlu0 %1138 }
 0x34c   : > { %2944 = vst.msk [vmem:[%s3919_s19 + $0x90] sm:$0xf] %vm1048_vm0, %v1139_v28 }
 0x34d   : > { %v1740_v24 = vpop.permute.xlu1 %1739  ;;  %1150 = vrot.lane.b32.xlu0 %v4165_v16, %s3502_s29 }
 0x34e   : > { %3089 = vst.msk [vmem:[%s3947_s21 + $0xd4] sm:$0xf] %vm1048_vm0, %v1740_v24 }
 0x34f   : > { %1480 = vrot.lane.b32.xlu1 %v4151_v1, %s3503_s10  ;;  %v1204_v57 = vpop.permute.xlu0 %1203 }
 0x350   : > { %2960 = vst.msk [vmem:[%s3919_s19 + $0xd0] sm:$0xf] %vm1048_vm0, %v1204_v57 }
 0x351   : > { %v1076_v32 = vpop.permute.xlu1 %1075  ;;  %1215 = vrot.lane.b32.xlu0 %v4165_v16, %s3503_s10 }
 0x352   : > { %2929 = vst.msk [vmem:[%s3919_s19 + $0x54] sm:$0xf] %vm1048_vm0, %v1076_v32 }
 0x353   : > { %1087 = vrot.lane.b32.xlu1 %v4176_v48, %s3501_s18  ;;  %v1341_v47 = vpop.permute.xlu0 %1340 }
 0x354   : > { %2992 = vst.msk [vmem:[%s3926_s20 + $0x50] sm:$0xf] %vm1048_vm0, %v1341_v47 }
 0x355   : > { %v1141_v25 = vpop.permute.xlu1 %1140  ;;  %1352 = vrot.lane.b32.xlu0 %v4170_v19, %s3501_s18 }
 0x356   : > { %2945 = vst.msk [vmem:[%s3919_s19 + $0x94] sm:$0xf] %vm1048_vm0, %v1141_v25 }
 0x357   : > { %1152 = vrot.lane.b32.xlu1 %v4176_v48, %s3502_s29  ;;  %v1406_v1 = vpop.permute.xlu0 %1405 }
 0x358   : > { %3008 = vst.msk [vmem:[%s3926_s20 + $0x90] sm:$0xf] %vm1048_vm0, %v1406_v1 }
 0x359   : > { %v1206_v16 = vpop.permute.xlu1 %1205  ;;  %1417 = vrot.lane.b32.xlu0 %v4170_v19, %s3502_s29 }
 0x35a   : > { %2961 = vst.msk [vmem:[%s3919_s19 + $0xd4] sm:$0xf] %vm1048_vm0, %v1206_v16 }
 0x35b   : > { %1217 = vrot.lane.b32.xlu1 %v4176_v48, %s3503_s10  ;;  %v1471_v52 = vpop.permute.xlu0 %1470 }
 0x35c   : > { %3024 = vst.msk [vmem:[%s3926_s20 + $0xd0] sm:$0xf] %vm1048_vm0, %v1471_v52 }
 0x35d   : > { %v1343_v55 = vpop.permute.xlu1 %1342  ;;  %1482 = vrot.lane.b32.xlu0 %v4170_v19, %s3503_s10 }
 0x35e   : > { %2993 = vst.msk [vmem:[%s3926_s20 + $0x54] sm:$0xf] %vm1048_vm0, %v1343_v55 }
 0x35f   : > { %1354 = vrot.lane.b32.xlu1 %v4183_v27, %s3501_s18  ;;  %v1620_v17 = vpop.permute.xlu0 %1619 }
 0x360   : > { %3062 = vst.msk [vmem:[%s3947_s21 + $0x68] sm:$0xf] %vm1048_vm0, %v1620_v17 }
 0x361   : > { %v1408_v61 = vpop.permute.xlu1 %1407  ;;  %1089 = vrot.lane.b32.xlu0 %v4197_v15, %s3501_s18 }
 0x362   : > { %3009 = vst.msk [vmem:[%s3926_s20 + $0x94] sm:$0xf] %vm1048_vm0, %v1408_v61 }
 0x363   : > { %1419 = vrot.lane.b32.xlu1 %v4183_v27, %s3502_s29  ;;  %v1685_v19 = vpop.permute.xlu0 %1684 }
 0x364   : > { %3078 = vst.msk [vmem:[%s3947_s21 + $0xa8] sm:$0xf] %vm1048_vm0, %v1685_v19 }
 0x365   : > { %v1473_v48 = vpop.permute.xlu1 %1472  ;;  %1154 = vrot.lane.b32.xlu0 %v4197_v15, %s3502_s29 }
 0x366   : > { %3025 = vst.msk [vmem:[%s3926_s20 + $0xd4] sm:$0xf] %vm1048_vm0, %v1473_v48 }
 0x367   : > { %1484 = vrot.lane.b32.xlu1 %v4183_v27, %s3503_s10  ;;  %v1750_v22 = vpop.permute.xlu0 %1749 }
 0x368   : > { %3094 = vst.msk [vmem:[%s3947_s21 + $0xe8] sm:$0xf] %vm1048_vm0, %v1750_v22 }
 0x369   : > { %v1622_v33 = vpop.permute.xlu1 %1621  ;;  %1219 = vrot.lane.b32.xlu0 %v4197_v15, %s3503_s10 }
 0x36a   : > { %3063 = vst.msk [vmem:[%s3947_s21 + $0x6c] sm:$0xf] %vm1048_vm0, %v1622_v33 }
 0x36b   : > { %1091 = vrot.lane.b32.xlu1 %v4208_v31, %s3501_s18  ;;  %v1616_v46 = vpop.permute.xlu0 %1615 }
 0x36c   : > { %3060 = vst.msk [vmem:[%s3947_s21 + $0x60] sm:$0xf] %vm1048_vm0, %v1616_v46 }
 0x36d   : > { %v1687_v8 = vpop.permute.xlu1 %1686  ;;  %1356 = vrot.lane.b32.xlu0 %v4202_v43, %s3501_s18 }
 0x36e   : > { %3079 = vst.msk [vmem:[%s3947_s21 + $0xac] sm:$0xf] %vm1048_vm0, %v1687_v8 }
 0x36f   : > { %1156 = vrot.lane.b32.xlu1 %v4208_v31, %s3502_s29  ;;  %v1681_v27 = vpop.permute.xlu0 %1680 }
 0x370   : > { %3076 = vst.msk [vmem:[%s3947_s21 + $0xa0] sm:$0xf] %vm1048_vm0, %v1681_v27 }
 0x371   : > { %v1752_v15 = vpop.permute.xlu1 %1751  ;;  %1421 = vrot.lane.b32.xlu0 %v4202_v43, %s3502_s29 }
 0x372   : > { %3095 = vst.msk [vmem:[%s3947_s21 + $0xec] sm:$0xf] %vm1048_vm0, %v1752_v15 }
 0x373   : > { %1221 = vrot.lane.b32.xlu1 %v4208_v31, %s3503_s10  ;;  %v1746_v5 = vpop.permute.xlu0 %1745 }
 0x374   : > { %3092 = vst.msk [vmem:[%s3947_s21 + $0xe0] sm:$0xf] %vm1048_vm0, %v1746_v5 }
 0x375   : > { %v1618_v10 = vpop.permute.xlu1 %1617  ;;  %1486 = vrot.lane.b32.xlu0 %v4202_v43, %s3503_s10 }
 0x376   : > { %3061 = vst.msk [vmem:[%s3947_s21 + $0x64] sm:$0xf] %vm1048_vm0, %v1618_v10 }
 0x377   : > { %1358 = vrot.lane.b32.xlu1 %v4215_v45, %s3501_s18  ;;  %v1078_v20 = vpop.permute.xlu0 %1077 }
 0x378   : > { %2930 = vst.msk [vmem:[%s3919_s19 + $0x58] sm:$0xf] %vm1048_vm0, %v1078_v20 }
 0x379   : > { %v1683_v40 = vpop.permute.xlu1 %1682  ;;  %1093 = vrot.lane.b32.xlu0 %v4229_v6, %s3501_s18 }
 0x37a   : > { %3077 = vst.msk [vmem:[%s3947_s21 + $0xa4] sm:$0xf] %vm1048_vm0, %v1683_v40 }
 0x37b   : > { %1423 = vrot.lane.b32.xlu1 %v4215_v45, %s3502_s29  ;;  %v1143_v43 = vpop.permute.xlu0 %1142 }
 0x37c   : > { %2946 = vst.msk [vmem:[%s3919_s19 + $0x98] sm:$0xf] %vm1048_vm0, %v1143_v43 }
 0x37d   : > { %v1748_v31 = vpop.permute.xlu1 %1747  ;;  %1158 = vrot.lane.b32.xlu0 %v4229_v6, %s3502_s29 }
 0x37e   : > { %3093 = vst.msk [vmem:[%s3947_s21 + $0xe4] sm:$0xf] %vm1048_vm0, %v1748_v31 }
 0x37f   : > { %1488 = vrot.lane.b32.xlu1 %v4215_v45, %s3503_s10  ;;  %v1208_v12 = vpop.permute.xlu0 %1207 }
 0x380   : > { %2962 = vst.msk [vmem:[%s3919_s19 + $0xd8] sm:$0xf] %vm1048_vm0, %v1208_v12 }
 0x381   : > { %v1080_v7 = vpop.permute.xlu1 %1079  ;;  %1223 = vrot.lane.b32.xlu0 %v4229_v6, %s3503_s10 }
 0x382   : > { %2931 = vst.msk [vmem:[%s3919_s19 + $0x5c] sm:$0xf] %vm1048_vm0, %v1080_v7 }
 0x383   : > { %1095 = vrot.lane.b32.xlu1 %v4240_v38, %s3501_s18  ;;  %v1345_v9 = vpop.permute.xlu0 %1344 }
 0x384   : > { %2994 = vst.msk [vmem:[%s3926_s20 + $0x58] sm:$0xf] %vm1048_vm0, %v1345_v9 }
 0x385   : > { %v1145_v26 = vpop.permute.xlu1 %1144  ;;  %1360 = vrot.lane.b32.xlu0 %v4234_v62, %s3501_s18 }
 0x386   : > { %2947 = vst.msk [vmem:[%s3919_s19 + $0x9c] sm:$0xf] %vm1048_vm0, %v1145_v26 }
 0x387   : > { %1160 = vrot.lane.b32.xlu1 %v4240_v38, %s3502_s29  ;;  %v1410_v45 = vpop.permute.xlu0 %1409 }
 0x388   : > { %3010 = vst.msk [vmem:[%s3926_s20 + $0x98] sm:$0xf] %vm1048_vm0, %v1410_v45 }
 0x389   : > { %v1210_v6 = vpop.permute.xlu1 %1209  ;;  %1425 = vrot.lane.b32.xlu0 %v4234_v62, %s3502_s29 }
 0x38a   : > { %2963 = vst.msk [vmem:[%s3919_s19 + $0xdc] sm:$0xf] %vm1048_vm0, %v1210_v6 }
 0x38b   : > { %1225 = vrot.lane.b32.xlu1 %v4240_v38, %s3503_s10  ;;  %v1475_v30 = vpop.permute.xlu0 %1474 }
 0x38c   : > { %3026 = vst.msk [vmem:[%s3926_s20 + $0xd8] sm:$0xf] %vm1048_vm0, %v1475_v30  ;;  %v1829_v30 = vld [vmem:[%s3919_s19] sm:$0xff] (%p3640_p10)  }
 0x38d   : > { %v1347_v49 = vpop.permute.xlu1 %1346  ;;  %1490 = vrot.lane.b32.xlu0 %v4234_v62, %s3503_s10  ;;  %1830 = vst [vmem:[%s4789_s9] sm:$0xff] (%p3640_p10), %v1829_v30  }
 0x38e   : > { %2995 = vst.msk [vmem:[%s3926_s20 + $0x5c] sm:$0xf] %vm1048_vm0, %v1347_v49  ;;  %v1833_v49 = vld [vmem:[%s3919_s19 + $0x8] sm:$0xff] (%p3640_p10)  }
 0x38f   : > { %1362 = vrot.lane.b32.xlu1 %v4247_v0, %s3501_s18  ;;  %v1628_v41 = vpop.permute.xlu0 %1627  ;;  %1834 = vst [vmem:[%s4789_s9 + $0x8] sm:$0xff] (%p3640_p10), %v1833_v49  }
 0x390   : > { %3066 = vst.msk [vmem:[%s3947_s21 + $0x78] sm:$0xf] %vm1048_vm0, %v1628_v41  ;;  %v1837_v41 = vld [vmem:[%s3919_s19 + $0x10] sm:$0xff] (%p3640_p10)  }
 0x391   : > { %v1412_v38 = vpop.permute.xlu1 %1411  ;;  %1757 = vrot.lane.b32.xlu0 %v4102_v44, %s3503_s10  ;;  %1838 = vst [vmem:[%s4789_s9 + $0x10] sm:$0xff] (%p3640_p10), %v1837_v41  }
 0x392   : > { %3011 = vst.msk [vmem:[%s3926_s20 + $0x9c] sm:$0xf] %vm1048_vm0, %v1412_v38  ;;  %v1841_v38 = vld [vmem:[%s3919_s19 + $0x18] sm:$0xff] (%p3640_p10)  }
 0x393   : > { %1427 = vrot.lane.b32.xlu1 %v4247_v0, %s3502_s29  ;;  %v1693_v62 = vpop.permute.xlu0 %1692  ;;  %1842 = vst [vmem:[%s4789_s9 + $0x18] sm:$0xff] (%p3640_p10), %v1841_v38  }
 0x394   : > { %3082 = vst.msk [vmem:[%s3947_s21 + $0xb8] sm:$0xf] %vm1048_vm0, %v1693_v62  ;;  %v1845_v62 = vld [vmem:[%s3919_s19 + $0x20] sm:$0xff] (%p3640_p10)  }
 0x395   : > { %v1477_v21 = vpop.permute.xlu1 %1476  ;;  %1846 = vst [vmem:[%s4789_s9 + $0x20] sm:$0xff] (%p3640_p10), %v1845_v62  }
 0x396   : > { %3027 = vst.msk [vmem:[%s3926_s20 + $0xdc] sm:$0xf] %vm1048_vm0, %v1477_v21  ;;  %v1849_v21 = vld [vmem:[%s3919_s19 + $0x28] sm:$0xff] (%p3640_p10)  }
 0x397   : > { %1492 = vrot.lane.b32.xlu1 %v4247_v0, %s3503_s10  ;;  %v1624_v29 = vpop.permute.xlu0 %1623  ;;  %1850 = vst [vmem:[%s4789_s9 + $0x28] sm:$0xff] (%p3640_p10), %v1849_v21  }
 0x398   : > { %3064 = vst.msk [vmem:[%s3947_s21 + $0x70] sm:$0xf] %vm1048_vm0, %v1624_v29  ;;  %v1853_v29 = vld [vmem:[%s3919_s19 + $0x30] sm:$0xff] (%p3640_p10)  }
 0x399   : > { %v1630_v44 = vpop.permute.xlu1 %1629  ;;  %1854 = vst [vmem:[%s4789_s9 + $0x30] sm:$0xff] (%p3640_p10), %v1853_v29  }
 0x39a   : > { %3067 = vst.msk [vmem:[%s3947_s21 + $0x7c] sm:$0xf] %vm1048_vm0, %v1630_v44  ;;  %v1857_v44 = vld [vmem:[%s3919_s19 + $0x38] sm:$0xff] (%p3640_p10)  }
 0x39b   : > { %1759 = vrot.lane.b32.xlu1 %v4116_v11, %s3503_s10  ;;  %v1689_v35 = vpop.permute.xlu0 %1688  ;;  %1858 = vst [vmem:[%s4789_s9 + $0x38] sm:$0xff] (%p3640_p10), %v1857_v44  }
 0x39c   : > { %3080 = vst.msk [vmem:[%s3947_s21 + $0xb0] sm:$0xf] %vm1048_vm0, %v1689_v35  ;;  %v1861_v35 = vld [vmem:[%s3919_s19 + $0x40] sm:$0xff] (%p3640_p10)  }
 0x39d   : > { %v1695_v37 = vpop.permute.xlu1 %1694  ;;  %1862 = vst [vmem:[%s4789_s9 + $0x80] sm:$0xff] (%p3640_p10), %v1861_v35  }
 0x39e   : > { %3083 = vst.msk [vmem:[%s3947_s21 + $0xbc] sm:$0xf] %vm1048_vm0, %v1695_v37  ;;  %v1865_v37 = vld [vmem:[%s3919_s19 + $0x48] sm:$0xff] (%p3640_p10)  }
 0x39f   : > { %v1754_v0 = vpop.permute.xlu0 %1753  ;;  %1866 = vst [vmem:[%s4789_s9 + $0x88] sm:$0xff] (%p3640_p10), %v1865_v37  }
 0x3a0   : > { %3096 = vst.msk [vmem:[%s3947_s21 + $0xf0] sm:$0xf] %vm1048_vm0, %v1754_v0  ;;  %v1869_v0 = vld [vmem:[%s3919_s19 + $0x50] sm:$0xff] (%p3640_p10)  }
 0x3a1   : > { %v1626_v34 = vpop.permute.xlu1 %1625  ;;  %1870 = vst [vmem:[%s4789_s9 + $0x90] sm:$0xff] (%p3640_p10), %v1869_v0  }
 0x3a2   : > { %3065 = vst.msk [vmem:[%s3947_s21 + $0x74] sm:$0xf] %vm1048_vm0, %v1626_v34  ;;  %v1873_v34 = vld [vmem:[%s3919_s19 + $0x58] sm:$0xff] (%p3640_p10)  }
 0x3a3   : > { %v1082_v18 = vpop.permute.xlu0 %1081  ;;  %1874 = vst [vmem:[%s4789_s9 + $0x98] sm:$0xff] (%p3640_p10), %v1873_v34  }
 0x3a4   : > { %2932 = vst.msk [vmem:[%s3919_s19 + $0x60] sm:$0xf] %vm1048_vm0, %v1082_v18 }
 0x3a5   : > { %v1691_v11 = vpop.permute.xlu1 %1690 }
 0x3a6   : > { %3081 = vst.msk [vmem:[%s3947_s21 + $0xb4] sm:$0xf] %vm1048_vm0, %v1691_v11 }
 0x3a7   : > { %v1147_v56 = vpop.permute.xlu0 %1146 }
 0x3a8   : > { %2948 = vst.msk [vmem:[%s3919_s19 + $0xa0] sm:$0xf] %vm1048_vm0, %v1147_v56 }
 0x3a9   : > { %v1756_v14 = vpop.permute.xlu1 %1755 }
 0x3aa   : > { %3097 = vst.msk [vmem:[%s3947_s21 + $0xf4] sm:$0xf] %vm1048_vm0, %v1756_v14 }
 0x3ab   : > { %v1212_v39 = vpop.permute.xlu0 %1211 }
 0x3ac   : > { %2964 = vst.msk [vmem:[%s3919_s19 + $0xe0] sm:$0xf] %vm1048_vm0, %v1212_v39  ;;  %v1893_v39 = vld [vmem:[%s3919_s19 + $0x80] sm:$0xff] (%p3640_p10)  }
 0x3ad   : > { %v1084_v23 = vpop.permute.xlu1 %1083  ;;  %1894 = vst [vmem:[%s4789_s9 + $0x100] sm:$0xff] (%p3640_p10), %v1893_v39  }
 0x3ae   : > { %2933 = vst.msk [vmem:[%s3919_s19 + $0x64] sm:$0xf] %vm1048_vm0, %v1084_v23  ;;  %v1897_v23 = vld [vmem:[%s3919_s19 + $0x88] sm:$0xff] (%p3640_p10)  }
 0x3af   : > { %v1349_v42 = vpop.permute.xlu0 %1348  ;;  %1898 = vst [vmem:[%s4789_s9 + $0x108] sm:$0xff] (%p3640_p10), %v1897_v23  }
 0x3b0   : > { %2996 = vst.msk [vmem:[%s3926_s20 + $0x60] sm:$0xf] %vm1048_vm0, %v1349_v42  ;;  %v1901_v42 = vld [vmem:[%s3919_s19 + $0x90] sm:$0xff] (%p3640_p10)  }
 0x3b1   : > { %v1149_v3 = vpop.permute.xlu1 %1148  ;;  %1902 = vst [vmem:[%s4789_s9 + $0x110] sm:$0xff] (%p3640_p10), %v1901_v42  }
 0x3b2   : > { %2949 = vst.msk [vmem:[%s3919_s19 + $0xa4] sm:$0xf] %vm1048_vm0, %v1149_v3  ;;  %v1905_v3 = vld [vmem:[%s3919_s19 + $0x98] sm:$0xff] (%p3640_p10)  }
 0x3b3   : > { %v1414_v50 = vpop.permute.xlu0 %1413  ;;  %1906 = vst [vmem:[%s4789_s9 + $0x118] sm:$0xff] (%p3640_p10), %v1905_v3  }
 0x3b4   : > { %3012 = vst.msk [vmem:[%s3926_s20 + $0xa0] sm:$0xf] %vm1048_vm0, %v1414_v50 }
 0x3b5   : > { %v1214_v36 = vpop.permute.xlu1 %1213  ;;  %v1877_v18 = vld [vmem:[%s3919_s19 + $0x60] sm:$0xff] (%p3640_p10)  }
 0x3b6   : > { %2965 = vst.msk [vmem:[%s3919_s19 + $0xe4] sm:$0xf] %vm1048_vm0, %v1214_v36  ;;  %1878 = vst [vmem:[%s4789_s9 + $0xa0] sm:$0xff] (%p3640_p10), %v1877_v18  }
 0x3b7   : > { %v1479_v51 = vpop.permute.xlu0 %1478 }
 0x3b8   : > { %3028 = vst.msk [vmem:[%s3926_s20 + $0xe0] sm:$0xf] %vm1048_vm0, %v1479_v51 }
 0x3b9   : > { %v1351_v4 = vpop.permute.xlu1 %1350  ;;  %v1909_v50 = vld [vmem:[%s3919_s19 + $0xa0] sm:$0xff] (%p3640_p10)  }
 0x3ba   : > { %2997 = vst.msk [vmem:[%s3926_s20 + $0x64] sm:$0xf] %vm1048_vm0, %v1351_v4  ;;  %1910 = vst [vmem:[%s4789_s9 + $0x120] sm:$0xff] (%p3640_p10), %v1909_v50  }
 0x3bb   : > { %v1086_v53 = vpop.permute.xlu0 %1085 }
 0x3bc   : > { %2934 = vst.msk [vmem:[%s3919_s19 + $0x68] sm:$0xf] %vm1048_vm0, %v1086_v53  ;;  %v1925_v53 = vld [vmem:[%s3919_s19 + $0xc0] sm:$0xff] (%p3640_p10)  }
 0x3bd   : > { %v1416_v54 = vpop.permute.xlu1 %1415  ;;  %1926 = vst [vmem:[%s4789_s9 + $0x180] sm:$0xff] (%p3640_p10), %v1925_v53  }
 0x3be   : > { %3013 = vst.msk [vmem:[%s3926_s20 + $0xa4] sm:$0xf] %vm1048_vm0, %v1416_v54  ;;  %v1929_v54 = vld [vmem:[%s3919_s19 + $0xc8] sm:$0xff] (%p3640_p10)  }
 0x3bf   : > { %v1151_v58 = vpop.permute.xlu0 %1150  ;;  %1930 = vst [vmem:[%s4789_s9 + $0x188] sm:$0xff] (%p3640_p10), %v1929_v54  }
 0x3c0   : > { %2950 = vst.msk [vmem:[%s3919_s19 + $0xa8] sm:$0xf] %vm1048_vm0, %v1151_v58  ;;  %v1933_v58 = vld [vmem:[%s3919_s19 + $0xd0] sm:$0xff] (%p3640_p10)  }
 0x3c1   : > { %v1481_v60 = vpop.permute.xlu1 %1480  ;;  %1934 = vst [vmem:[%s4789_s9 + $0x190] sm:$0xff] (%p3640_p10), %v1933_v58  }
 0x3c2   : > { %3029 = vst.msk [vmem:[%s3926_s20 + $0xe4] sm:$0xf] %vm1048_vm0, %v1481_v60  ;;  %v1937_v60 = vld [vmem:[%s3919_s19 + $0xd8] sm:$0xff] (%p3640_p10)  }
 0x3c3   : > { %v1216_v59 = vpop.permute.xlu0 %1215  ;;  %1938 = vst [vmem:[%s4789_s9 + $0x198] sm:$0xff] (%p3640_p10), %v1937_v60  }
 0x3c4   : > { %2966 = vst.msk [vmem:[%s3919_s19 + $0xe8] sm:$0xf] %vm1048_vm0, %v1216_v59  ;;  %v1941_v59 = vld [vmem:[%s3919_s19 + $0xe0] sm:$0xff] (%p3640_p10)  }
 0x3c5   : > { %v1088_v13 = vpop.permute.xlu1 %1087  ;;  %1942 = vst [vmem:[%s4789_s9 + $0x1a0] sm:$0xff] (%p3640_p10), %v1941_v59  }
 0x3c6   : > { %2935 = vst.msk [vmem:[%s3919_s19 + $0x6c] sm:$0xf] %vm1048_vm0, %v1088_v13 }
 0x3c7   : > { %v1353_v63 = vpop.permute.xlu0 %1352 }
 0x3c8   : > { %2998 = vst.msk [vmem:[%s3926_s20 + $0x68] sm:$0xf] %vm1048_vm0, %v1353_v63 }
 0x3c9   : > { %v1153_v2 = vpop.permute.xlu1 %1152 }
 0x3ca   : > { %2951 = vst.msk [vmem:[%s3919_s19 + $0xac] sm:$0xf] %vm1048_vm0, %v1153_v2 }
 0x3cb   : > { %v1418_v28 = vpop.permute.xlu0 %1417 }
 0x3cc   : > { %3014 = vst.msk [vmem:[%s3926_s20 + $0xa8] sm:$0xf] %vm1048_vm0, %v1418_v28 }
 0x3cd   : > { %v1218_v24 = vpop.permute.xlu1 %1217  ;;  %v1881_v11 = vld [vmem:[%s3919_s19 + $0x68] sm:$0xff] (%p3640_p10)  }
 0x3ce   : > { %2967 = vst.msk [vmem:[%s3919_s19 + $0xec] sm:$0xf] %vm1048_vm0, %v1218_v24  ;;  %1882 = vst [vmem:[%s4789_s9 + $0xa8] sm:$0xff] (%p3640_p10), %v1881_v11  }
 0x3cf   : > { %v1483_v57 = vpop.permute.xlu0 %1482 }
 0x3d0   : > { %3030 = vst.msk [vmem:[%s3926_s20 + $0xe8] sm:$0xf] %vm1048_vm0, %v1483_v57 }
 0x3d1   : > { %v1355_v32 = vpop.permute.xlu1 %1354  ;;  %v1913_v36 = vld [vmem:[%s3919_s19 + $0xa8] sm:$0xff] (%p3640_p10)  }
 0x3d2   : > { %2999 = vst.msk [vmem:[%s3926_s20 + $0x6c] sm:$0xf] %vm1048_vm0, %v1355_v32  ;;  %1914 = vst [vmem:[%s4789_s9 + $0x128] sm:$0xff] (%p3640_p10), %v1913_v36  }
 0x3d3   : > { %v1090_v47 = vpop.permute.xlu0 %1089 }
 0x3d4   : > { %2936 = vst.msk [vmem:[%s3919_s19 + $0x70] sm:$0xf] %vm1048_vm0, %v1090_v47 }
 0x3d5   : > { %v1420_v25 = vpop.permute.xlu1 %1419  ;;  %v1945_v13 = vld [vmem:[%s3919_s19 + $0xe8] sm:$0xff] (%p3640_p10)  }
 0x3d6   : > { %3015 = vst.msk [vmem:[%s3926_s20 + $0xac] sm:$0xf] %vm1048_vm0, %v1420_v25  ;;  %1946 = vst [vmem:[%s4789_s9 + $0x1a8] sm:$0xff] (%p3640_p10), %v1945_v13  }
 0x3d7   : > { %v1155_v1 = vpop.permute.xlu0 %1154 }
 0x3d8   : > { %2952 = vst.msk [vmem:[%s3919_s19 + $0xb0] sm:$0xf] %vm1048_vm0, %v1155_v1 }
 0x3d9   : > { %v1485_v16 = vpop.permute.xlu1 %1484 }
 0x3da   : > { %3031 = vst.msk [vmem:[%s3926_s20 + $0xec] sm:$0xf] %vm1048_vm0, %v1485_v16 }
 0x3db   : > { %v1220_v52 = vpop.permute.xlu0 %1219 }
 0x3dc   : > { %2968 = vst.msk [vmem:[%s3919_s19 + $0xf0] sm:$0xf] %vm1048_vm0, %v1220_v52 }
 0x3dd   : > { %v1092_v55 = vpop.permute.xlu1 %1091 }
 0x3de   : > { %2937 = vst.msk [vmem:[%s3919_s19 + $0x74] sm:$0xf] %vm1048_vm0, %v1092_v55 }
 0x3df   : > { %v1357_v17 = vpop.permute.xlu0 %1356 }
 0x3e0   : > { %3000 = vst.msk [vmem:[%s3926_s20 + $0x70] sm:$0xf] %vm1048_vm0, %v1357_v17 }
 0x3e1   : > { %v1157_v61 = vpop.permute.xlu1 %1156 }
 0x3e2   : > { %2953 = vst.msk [vmem:[%s3919_s19 + $0xb4] sm:$0xf] %vm1048_vm0, %v1157_v61 }
 0x3e3   : > { %v1422_v19 = vpop.permute.xlu0 %1421 }
 0x3e4   : > { %3016 = vst.msk [vmem:[%s3926_s20 + $0xb0] sm:$0xf] %vm1048_vm0, %v1422_v19 }
 0x3e5   : > { %v1222_v48 = vpop.permute.xlu1 %1221  ;;  %v1885_v56 = vld [vmem:[%s3919_s19 + $0x70] sm:$0xff] (%p3640_p10)  }
 0x3e6   : > { %2969 = vst.msk [vmem:[%s3919_s19 + $0xf4] sm:$0xf] %vm1048_vm0, %v1222_v48  ;;  %1886 = vst [vmem:[%s4789_s9 + $0xb0] sm:$0xff] (%p3640_p10), %v1885_v56  }
 0x3e7   : > { %v1487_v22 = vpop.permute.xlu0 %1486 }
 0x3e8   : > { %3032 = vst.msk [vmem:[%s3926_s20 + $0xf0] sm:$0xf] %vm1048_vm0, %v1487_v22 }
 0x3e9   : > { %v1359_v33 = vpop.permute.xlu1 %1358  ;;  %v1917_v51 = vld [vmem:[%s3919_s19 + $0xb0] sm:$0xff] (%p3640_p10)  }
 0x3ea   : > { %3001 = vst.msk [vmem:[%s3926_s20 + $0x74] sm:$0xf] %vm1048_vm0, %v1359_v33  ;;  %1918 = vst [vmem:[%s4789_s9 + $0x130] sm:$0xff] (%p3640_p10), %v1917_v51  }
 0x3eb   : > { %v1094_v46 = vpop.permute.xlu0 %1093 }
 0x3ec   : > { %2938 = vst.msk [vmem:[%s3919_s19 + $0x78] sm:$0xf] %vm1048_vm0, %v1094_v46 }
 0x3ed   : > { %v1424_v8 = vpop.permute.xlu1 %1423  ;;  %v1949_v63 = vld [vmem:[%s3919_s19 + $0xf0] sm:$0xff] (%p3640_p10)  }
 0x3ee   : > { %3017 = vst.msk [vmem:[%s3926_s20 + $0xb4] sm:$0xf] %vm1048_vm0, %v1424_v8  ;;  %1950 = vst [vmem:[%s4789_s9 + $0x1b0] sm:$0xff] (%p3640_p10), %v1949_v63  }
 0x3ef   : > { %v1159_v27 = vpop.permute.xlu0 %1158 }
 0x3f0   : > { %2954 = vst.msk [vmem:[%s3919_s19 + $0xb8] sm:$0xf] %vm1048_vm0, %v1159_v27 }
 0x3f1   : > { %v1489_v15 = vpop.permute.xlu1 %1488 }
 0x3f2   : > { %3033 = vst.msk [vmem:[%s3926_s20 + $0xf4] sm:$0xf] %vm1048_vm0, %v1489_v15 }
 0x3f3   : > { %v1224_v5 = vpop.permute.xlu0 %1223 }
 0x3f4   : > { %2970 = vst.msk [vmem:[%s3919_s19 + $0xf8] sm:$0xf] %vm1048_vm0, %v1224_v5 }
 0x3f5   : > { %v1096_v10 = vpop.permute.xlu1 %1095 }
 0x3f6   : > { %2939 = vst.msk [vmem:[%s3919_s19 + $0x7c] sm:$0xf] %vm1048_vm0, %v1096_v10 }
 0x3f7   : > { %v1361_v20 = vpop.permute.xlu0 %1360 }
 0x3f8   : > { %3002 = vst.msk [vmem:[%s3926_s20 + $0x78] sm:$0xf] %vm1048_vm0, %v1361_v20 }
 0x3f9   : > { %v1161_v40 = vpop.permute.xlu1 %1160 }
 0x3fa   : > { %2955 = vst.msk [vmem:[%s3919_s19 + $0xbc] sm:$0xf] %vm1048_vm0, %v1161_v40 }
 0x3fb   : > { %v1426_v43 = vpop.permute.xlu0 %1425 }
 0x3fc   : > { %3018 = vst.msk [vmem:[%s3926_s20 + $0xb8] sm:$0xf] %vm1048_vm0, %v1426_v43 }
 0x3fd   : > { %v1226_v31 = vpop.permute.xlu1 %1225  ;;  %v1889_v14 = vld [vmem:[%s3919_s19 + $0x78] sm:$0xff] (%p3640_p10)  }
 0x3fe   : > { %2971 = vst.msk [vmem:[%s3919_s19 + $0xfc] sm:$0xf] %vm1048_vm0, %v1226_v31  ;;  %1890 = vst [vmem:[%s4789_s9 + $0xb8] sm:$0xff] (%p3640_p10), %v1889_v14  }
 0x3ff   : > { %v1491_v12 = vpop.permute.xlu0 %1490 }
 0x400   : > { %3034 = vst.msk [vmem:[%s3926_s20 + $0xf8] sm:$0xf] %vm1048_vm0, %v1491_v12 }
 0x401   : > { %v1363_v7 = vpop.permute.xlu1 %1362  ;;  %v1921_v4 = vld [vmem:[%s3919_s19 + $0xb8] sm:$0xff] (%p3640_p10)  }
 0x402   : > { %3003 = vst.msk [vmem:[%s3926_s20 + $0x7c] sm:$0xf] %vm1048_vm0, %v1363_v7  ;;  %1922 = vst [vmem:[%s4789_s9 + $0x138] sm:$0xff] (%p3640_p10), %v1921_v4  }
 0x403   : > { %v1758_v9 = vpop.permute.xlu0 %1757 }
 0x404   : > { %3098 = vst.msk [vmem:[%s3947_s21 + $0xf8] sm:$0xf] %vm1048_vm0, %v1758_v9 }
 0x405   : > { %v1428_v26 = vpop.permute.xlu1 %1427  ;;  %v1953_v2 = vld [vmem:[%s3919_s19 + $0xf8] sm:$0xff] (%p3640_p10)  }
 0x406   : > { %3019 = vst.msk [vmem:[%s3926_s20 + $0xbc] sm:$0xf] %vm1048_vm0, %v1428_v26  ;;  %1954 = vst [vmem:[%s4789_s9 + $0x1b8] sm:$0xff] (%p3640_p10), %v1953_v2  }
 0x408   : > { %1808 = sbr.rel (!%p3640_p10) target bundleno = 1039 (0x40f), region = 48 }
 0x409   : > { %v1493_v45 = vpop.permute.xlu1 %1492 }
 0x40a   : > { %3035 = vst.msk [vmem:[%s3926_s20 + $0xfc] sm:$0xf] %vm1048_vm0, %v1493_v45 }
 0x40d   : > { %v1760_v6 = vpop.permute.xlu1 %1759 }
 0x40e   : > { %3099 = vst.msk [vmem:[%s3947_s21 + $0xfc] sm:$0xf] %vm1048_vm0, %v1760_v6 }
 0x40f PF: > { %2107 = sbr.rel (!%p3640_p10) target bundleno = 1065 (0x429), region = 89  ;;  %s5049_s7 = sld [smem:[#allocation11_spill]] (%p3640_p10)  ;;  %v2128_v28 = vld [vmem:[%s3926_s20] sm:$0xff] (%p3640_p10)   ;;  %v2132_v24 = vld [vmem:[%s3926_s20 + $0x8] sm:$0xff] (%p3640_p10)   ;;  %v2136_v57 = vld [vmem:[%s3926_s20 + $0x10] sm:$0xff] (%p3640_p10)  }
 0x410   : > { %s3107_s2 = sshll.u32 (%p3640_p10), %s3480_s25, 7  ;;  %v2140_v32 = vld [vmem:[%s3926_s20 + $0x18] sm:$0xff] (%p3640_p10)   ;;  %v2144_v47 = vld [vmem:[%s3926_s20 + $0x20] sm:$0xff] (%p3640_p10)   ;;  %v2148_v25 = vld [vmem:[%s3926_s20 + $0x28] sm:$0xff] (%p3640_p10)   ;;  %s5050_s10 = sld [smem:[#allocation15_spill]] (%p3640_p10) }
 0x411   : > { %v2152_v1 = vld [vmem:[%s3926_s20 + $0x30] sm:$0xff] (%p3640_p10)   ;;  %v2156_v16 = vld [vmem:[%s3926_s20 + $0x38] sm:$0xff] (%p3640_p10)   ;;  %v2160_v52 = vld [vmem:[%s3926_s20 + $0x40] sm:$0xff] (%p3640_p10)  }
 0x412   : > { %v2164_v55 = vld [vmem:[%s3926_s20 + $0x48] sm:$0xff] (%p3640_p10)   ;;  %v2168_v17 = vld [vmem:[%s3926_s20 + $0x50] sm:$0xff] (%p3640_p10)   ;;  %v2172_v61 = vld [vmem:[%s3926_s20 + $0x58] sm:$0xff] (%p3640_p10)  }
 0x413   : > { %v2176_v19 = vld [vmem:[%s3926_s20 + $0x60] sm:$0xff] (%p3640_p10)   ;;  %v2180_v48 = vld [vmem:[%s3926_s20 + $0x68] sm:$0xff] (%p3640_p10)   ;;  %v2184_v22 = vld [vmem:[%s3926_s20 + $0x70] sm:$0xff] (%p3640_p10)  }
 0x414   : > { %v2188_v33 = vld [vmem:[%s3926_s20 + $0x78] sm:$0xff] (%p3640_p10)   ;;  %v2192_v46 = vld [vmem:[%s3926_s20 + $0x80] sm:$0xff] (%p3640_p10)   ;;  %v2196_v8 = vld [vmem:[%s3926_s20 + $0x88] sm:$0xff] (%p3640_p10)  }
 0x415   : > { %s3106_s17 = sshll.u32 (%p3640_p10), %s5049_s7, 4  ;;  %v2200_v27 = vld [vmem:[%s3926_s20 + $0x90] sm:$0xff] (%p3640_p10)   ;;  %v2204_v15 = vld [vmem:[%s3926_s20 + $0x98] sm:$0xff] (%p3640_p10)   ;;  %v2208_v5 = vld [vmem:[%s3926_s20 + $0xa0] sm:$0xff] (%p3640_p10)  }
 0x416   : > { %s2110_s12 = sadd.s32 %s3107_s2, %s3106_s17  ;;  %v2212_v10 = vld [vmem:[%s3926_s20 + $0xa8] sm:$0xff]   ;;  %v2216_v20 = vld [vmem:[%s3926_s20 + $0xb0] sm:$0xff]   ;;  %v2220_v40 = vld [vmem:[%s3926_s20 + $0xb8] sm:$0xff]  }
 0x417   : > { %s3108_s19 = sshll.u32 %s2110_s12, 2  ;;  %v2224_v43 = vld [vmem:[%s3926_s20 + $0xc0] sm:$0xff]   ;;  %v2228_v31 = vld [vmem:[%s3926_s20 + $0xc8] sm:$0xff]   ;;  %v2232_v12 = vld [vmem:[%s3926_s20 + $0xd0] sm:$0xff]  }
 0x418   : > { %s4862_s13 = scalar_lea.vmem %s5050_s10, %s3108_s19  ;;  %v2236_v7 = vld [vmem:[%s3926_s20 + $0xd8] sm:$0xff]   ;;  %v2240_v9 = vld [vmem:[%s3926_s20 + $0xe0] sm:$0xff]   ;;  %v2244_v26 = vld [vmem:[%s3926_s20 + $0xe8] sm:$0xff]  }
 0x419   : > { %2129 = vst [vmem:[%s4862_s13] sm:$0xff] %v2128_v28   ;;  %2133 = vst [vmem:[%s4862_s13 + $0x8] sm:$0xff] %v2132_v24   ;;  %v2248_v45 = vld [vmem:[%s3926_s20 + $0xf0] sm:$0xff]   ;;  %v2252_v6 = vld [vmem:[%s3926_s20 + $0xf8] sm:$0xff]  }
 0x41a   : > { %2137 = vst [vmem:[%s4862_s13 + $0x10] sm:$0xff] %v2136_v57   ;;  %2141 = vst [vmem:[%s4862_s13 + $0x18] sm:$0xff] %v2140_v32  }
 0x41b   : > { %2145 = vst [vmem:[%s4862_s13 + $0x20] sm:$0xff] %v2144_v47   ;;  %2149 = vst [vmem:[%s4862_s13 + $0x28] sm:$0xff] %v2148_v25  }
 0x41c   : > { %2153 = vst [vmem:[%s4862_s13 + $0x30] sm:$0xff] %v2152_v1   ;;  %2157 = vst [vmem:[%s4862_s13 + $0x38] sm:$0xff] %v2156_v16  }
 0x41d   : > { %2161 = vst [vmem:[%s4862_s13 + $0x80] sm:$0xff] %v2160_v52   ;;  %2165 = vst [vmem:[%s4862_s13 + $0x88] sm:$0xff] %v2164_v55  }
 0x41e   : > { %2169 = vst [vmem:[%s4862_s13 + $0x90] sm:$0xff] %v2168_v17   ;;  %2173 = vst [vmem:[%s4862_s13 + $0x98] sm:$0xff] %v2172_v61  }
 0x41f   : > { %2177 = vst [vmem:[%s4862_s13 + $0xa0] sm:$0xff] %v2176_v19   ;;  %2181 = vst [vmem:[%s4862_s13 + $0xa8] sm:$0xff] %v2180_v48  }
 0x420   : > { %2185 = vst [vmem:[%s4862_s13 + $0xb0] sm:$0xff] %v2184_v22   ;;  %2189 = vst [vmem:[%s4862_s13 + $0xb8] sm:$0xff] %v2188_v33  }
 0x421   : > { %2193 = vst [vmem:[%s4862_s13 + $0x100] sm:$0xff] %v2192_v46   ;;  %2197 = vst [vmem:[%s4862_s13 + $0x108] sm:$0xff] %v2196_v8  }
 0x422   : > { %2201 = vst [vmem:[%s4862_s13 + $0x110] sm:$0xff] %v2200_v27   ;;  %2205 = vst [vmem:[%s4862_s13 + $0x118] sm:$0xff] %v2204_v15  }
 0x423   : > { %2209 = vst [vmem:[%s4862_s13 + $0x120] sm:$0xff] %v2208_v5   ;;  %2213 = vst [vmem:[%s4862_s13 + $0x128] sm:$0xff] %v2212_v10  }
 0x424   : > { %2217 = vst [vmem:[%s4862_s13 + $0x130] sm:$0xff] %v2216_v20   ;;  %2221 = vst [vmem:[%s4862_s13 + $0x138] sm:$0xff] %v2220_v40  }
 0x425   : > { %2225 = vst [vmem:[%s4862_s13 + $0x180] sm:$0xff] %v2224_v43   ;;  %2229 = vst [vmem:[%s4862_s13 + $0x188] sm:$0xff] %v2228_v31  }
 0x426   : > { %2233 = vst [vmem:[%s4862_s13 + $0x190] sm:$0xff] %v2232_v12   ;;  %2237 = vst [vmem:[%s4862_s13 + $0x198] sm:$0xff] %v2236_v7  }
 0x427   : > { %2241 = vst [vmem:[%s4862_s13 + $0x1a0] sm:$0xff] %v2240_v9   ;;  %2245 = vst [vmem:[%s4862_s13 + $0x1a8] sm:$0xff] %v2244_v26  }
 0x428   : > { %2249 = vst [vmem:[%s4862_s13 + $0x1b0] sm:$0xff] %v2248_v45   ;;  %2253 = vst [vmem:[%s4862_s13 + $0x1b8] sm:$0xff] %v2252_v6  }
 0x429 PF: > { %2406 = sbr.rel (!%p3640_p10) target bundleno = 1091 (0x443), region = 130  ;;  %s5051_s16 = sld [smem:[#allocation11_spill]] (%p3640_p10)  ;;  %v2427_v30 = vld [vmem:[%s3947_s21] sm:$0xff] (%p3640_p10)   ;;  %v2431_v49 = vld [vmem:[%s3947_s21 + $0x8] sm:$0xff] (%p3640_p10)   ;;  %v2435_v41 = vld [vmem:[%s3947_s21 + $0x10] sm:$0xff] (%p3640_p10)  }
 0x42a   : > { %s3110_s4 = sshll.u32 (%p3640_p10), %s3480_s25, 7  ;;  %v2439_v38 = vld [vmem:[%s3947_s21 + $0x18] sm:$0xff] (%p3640_p10)   ;;  %v2443_v62 = vld [vmem:[%s3947_s21 + $0x20] sm:$0xff] (%p3640_p10)   ;;  %v2447_v21 = vld [vmem:[%s3947_s21 + $0x28] sm:$0xff] (%p3640_p10)   ;;  %s5052_s30 = sld [smem:[#allocation16_spill]] (%p3640_p10) }
 0x42b   : > { %v2451_v29 = vld [vmem:[%s3947_s21 + $0x30] sm:$0xff] (%p3640_p10)   ;;  %v2455_v44 = vld [vmem:[%s3947_s21 + $0x38] sm:$0xff] (%p3640_p10)   ;;  %v2459_v35 = vld [vmem:[%s3947_s21 + $0x40] sm:$0xff] (%p3640_p10)  }
 0x42c   : > { %v2463_v37 = vld [vmem:[%s3947_s21 + $0x48] sm:$0xff] (%p3640_p10)   ;;  %v2467_v0 = vld [vmem:[%s3947_s21 + $0x50] sm:$0xff] (%p3640_p10)   ;;  %v2471_v34 = vld [vmem:[%s3947_s21 + $0x58] sm:$0xff] (%p3640_p10)  }
 0x42d   : > { %v2475_v18 = vld [vmem:[%s3947_s21 + $0x60] sm:$0xff] (%p3640_p10)   ;;  %v2479_v11 = vld [vmem:[%s3947_s21 + $0x68] sm:$0xff] (%p3640_p10)   ;;  %v2483_v56 = vld [vmem:[%s3947_s21 + $0x70] sm:$0xff] (%p3640_p10)  }
 0x42e   : > { %v2487_v14 = vld [vmem:[%s3947_s21 + $0x78] sm:$0xff] (%p3640_p10)   ;;  %v2491_v39 = vld [vmem:[%s3947_s21 + $0x80] sm:$0xff] (%p3640_p10)   ;;  %v2495_v23 = vld [vmem:[%s3947_s21 + $0x88] sm:$0xff] (%p3640_p10)  }
 0x42f   : > { %s3109_s20 = sshll.u32 (%p3640_p10), %s5051_s16, 4  ;;  %v2499_v42 = vld [vmem:[%s3947_s21 + $0x90] sm:$0xff] (%p3640_p10)   ;;  %v2503_v3 = vld [vmem:[%s3947_s21 + $0x98] sm:$0xff] (%p3640_p10)   ;;  %v2507_v50 = vld [vmem:[%s3947_s21 + $0xa0] sm:$0xff] (%p3640_p10)  }
 0x430   : > { %s2409_s11 = sadd.s32 %s3110_s4, %s3109_s20  ;;  %v2511_v36 = vld [vmem:[%s3947_s21 + $0xa8] sm:$0xff]   ;;  %v2515_v51 = vld [vmem:[%s3947_s21 + $0xb0] sm:$0xff]   ;;  %v2519_v4 = vld [vmem:[%s3947_s21 + $0xb8] sm:$0xff]  }
 0x431   : > { %s3111_s5 = sshll.u32 %s2409_s11, 2  ;;  %v2523_v53 = vld [vmem:[%s3947_s21 + $0xc0] sm:$0xff]   ;;  %v2527_v54 = vld [vmem:[%s3947_s21 + $0xc8] sm:$0xff]   ;;  %v2531_v58 = vld [vmem:[%s3947_s21 + $0xd0] sm:$0xff]  }
 0x432   : > { %s4935_s8 = scalar_lea.vmem %s5052_s30, %s3111_s5  ;;  %v2535_v60 = vld [vmem:[%s3947_s21 + $0xd8] sm:$0xff]   ;;  %v2539_v59 = vld [vmem:[%s3947_s21 + $0xe0] sm:$0xff]   ;;  %v2543_v13 = vld [vmem:[%s3947_s21 + $0xe8] sm:$0xff]  }
 0x433   : > { %2428 = vst [vmem:[%s4935_s8] sm:$0xff] %v2427_v30   ;;  %2432 = vst [vmem:[%s4935_s8 + $0x8] sm:$0xff] %v2431_v49   ;;  %v2547_v63 = vld [vmem:[%s3947_s21 + $0xf0] sm:$0xff]   ;;  %v2551_v2 = vld [vmem:[%s3947_s21 + $0xf8] sm:$0xff]  }
 0x434   : > { %2436 = vst [vmem:[%s4935_s8 + $0x10] sm:$0xff] %v2435_v41   ;;  %2440 = vst [vmem:[%s4935_s8 + $0x18] sm:$0xff] %v2439_v38  }
 0x435   : > { %2444 = vst [vmem:[%s4935_s8 + $0x20] sm:$0xff] %v2443_v62   ;;  %2448 = vst [vmem:[%s4935_s8 + $0x28] sm:$0xff] %v2447_v21  }
 0x436   : > { %2452 = vst [vmem:[%s4935_s8 + $0x30] sm:$0xff] %v2451_v29   ;;  %2456 = vst [vmem:[%s4935_s8 + $0x38] sm:$0xff] %v2455_v44  }
 0x437   : > { %2460 = vst [vmem:[%s4935_s8 + $0x80] sm:$0xff] %v2459_v35   ;;  %2464 = vst [vmem:[%s4935_s8 + $0x88] sm:$0xff] %v2463_v37  }
 0x438   : > { %2468 = vst [vmem:[%s4935_s8 + $0x90] sm:$0xff] %v2467_v0   ;;  %2472 = vst [vmem:[%s4935_s8 + $0x98] sm:$0xff] %v2471_v34  }
 0x439   : > { %2476 = vst [vmem:[%s4935_s8 + $0xa0] sm:$0xff] %v2475_v18   ;;  %2480 = vst [vmem:[%s4935_s8 + $0xa8] sm:$0xff] %v2479_v11  }
 0x43a   : > { %2484 = vst [vmem:[%s4935_s8 + $0xb0] sm:$0xff] %v2483_v56   ;;  %2488 = vst [vmem:[%s4935_s8 + $0xb8] sm:$0xff] %v2487_v14  }
 0x43b   : > { %2492 = vst [vmem:[%s4935_s8 + $0x100] sm:$0xff] %v2491_v39   ;;  %2496 = vst [vmem:[%s4935_s8 + $0x108] sm:$0xff] %v2495_v23  }
 0x43c   : > { %2500 = vst [vmem:[%s4935_s8 + $0x110] sm:$0xff] %v2499_v42   ;;  %2504 = vst [vmem:[%s4935_s8 + $0x118] sm:$0xff] %v2503_v3  }
 0x43d   : > { %2508 = vst [vmem:[%s4935_s8 + $0x120] sm:$0xff] %v2507_v50   ;;  %2512 = vst [vmem:[%s4935_s8 + $0x128] sm:$0xff] %v2511_v36  }
 0x43e   : > { %2516 = vst [vmem:[%s4935_s8 + $0x130] sm:$0xff] %v2515_v51   ;;  %2520 = vst [vmem:[%s4935_s8 + $0x138] sm:$0xff] %v2519_v4  }
 0x43f   : > { %2524 = vst [vmem:[%s4935_s8 + $0x180] sm:$0xff] %v2523_v53   ;;  %2528 = vst [vmem:[%s4935_s8 + $0x188] sm:$0xff] %v2527_v54  }
 0x440   : > { %2532 = vst [vmem:[%s4935_s8 + $0x190] sm:$0xff] %v2531_v58   ;;  %2536 = vst [vmem:[%s4935_s8 + $0x198] sm:$0xff] %v2535_v60  }
 0x441   : > { %2540 = vst [vmem:[%s4935_s8 + $0x1a0] sm:$0xff] %v2539_v59   ;;  %2544 = vst [vmem:[%s4935_s8 + $0x1a8] sm:$0xff] %v2543_v13  }
 0x442   : > { %2548 = vst [vmem:[%s4935_s8 + $0x1b0] sm:$0xff] %v2547_v63   ;;  %2552 = vst [vmem:[%s4935_s8 + $0x1b8] sm:$0xff] %v2551_v2  }
 0x443 PF: > { %s21_s28 = sadd.s32 1, %s3492_s28   ;;  %s5053_s9 = sld [smem:[#allocation12_spill]] }
 0x444   : > { %p18_p10 = scmp.ge.s32.totalorder %s21_s28, 6   ;;  %s5054_s21 = smov %s3468_s22 }
 0x445   : > { %s5055_s22 = smov %s3472_s23  ;;  %s5056_s23 = smov %s3653_s14 }
 0x446   : > { %s5057_s24 = smov %s3484_s26  ;;  %s5058_s25 = smov %s3488_s27 }
 0x447   : > { %s5060_s27 = smov %s5066_s15  ;;  %20 = sbr.rel (!%p18_p10) target bundleno = 11 (0xb), region = 239 }
 0x449   : > { %s5059_s26 = smov %s5053_s9 }
 0x44e   :  { %2729 = vsyncpa [#allocation3], 1 }
 0x44f   :  { %2731 = vsyncpa [#allocation3 + $0x1], 1 }
 0x450   :  { %2732 = vsyncpa [#allocation5], 1 }

</bundles_post_ra>
